<compile_context>
chip_gen: v7x
topology: tpu7x:2x2x1
jax: 0.10.0
libtpu: 0.0.40
codegen_flags: <defaults>
</compile_context>

<pallas_src>
import functools

import jax
import jax.numpy as jnp
from jax import lax
from jax.experimental import pallas as pl
from jax.experimental.pallas import tpu as pltpu


# ---------------------------------------------------------------------------
# In-kernel helpers
# ---------------------------------------------------------------------------
def _sigmoid(x):
    # sigmoid(x) = 0.5*tanh(0.5*x) + 0.5 : one EUP op instead of exp + recip.
    return 0.5 * jnp.tanh(0.5 * x) + 0.5


def _lstm_recurrence(tmax, x_ref, len_ref, wih_ref, whh_ref, b_ref,
                     h_scr, c_scr, gx_scr):
    """Forward LSTM over a whole time block in lane-dense [H, TILE_N] layout."""
    H, TN = h_scr.shape
    T = gx_scr.shape[1] // TN

    # One batched input projection (+ bias broadcast) for the whole time block.
    gx_scr[...] = (jnp.dot(wih_ref[...], x_ref[...],
                           preferred_element_type=jnp.float32)
                   + b_ref[...])                          # [4H, T*TN] f32

    h_scr[...] = jnp.zeros_like(h_scr)
    c_scr[...] = jnp.zeros_like(c_scr)

    # Loop invariants hoisted out of the unrolled time loop.
    lengths = len_ref[...]                                # [1, TN] int32
    whh = whh_ref[...]                                    # [4H, H] bf16

    def step(t):
        h = h_scr[...]                                    # [H, TN] f32
        c = c_scr[...]
        gates = (gx_scr[:, t * TN:(t + 1) * TN]           # static lane slice
                 + jnp.dot(whh, h.astype(whh.dtype),
                           preferred_element_type=jnp.float32))
        i = _sigmoid(gates[0 * H:1 * H])
        f = _sigmoid(gates[1 * H:2 * H])
        g = jnp.tanh(gates[2 * H:3 * H])
        o = _sigmoid(gates[3 * H:4 * H])
        c_new = f * c + i * g
        h_new = o * jnp.tanh(c_new)
        active = t < lengths                              # per-word freeze mask
        h_scr[...] = jnp.where(active, h_new, h)
        c_scr[...] = jnp.where(active, c_new, c)

    # Statically unrolled time loop; runtime-skipped past this tile's longest
    # word via the scalar-prefetched per-tile tmax.
    for t in range(T):
        pl.when(t < tmax)(functools.partial(step, t))

    return lengths


def _char_lstm_kernel_bi(tmax_ref, x_ref, xlast_ref, len_ref,
                         wih_f, whh_f, b_f, wih_b, b_b,
                         out_ref, h_scr, c_scr, gx_scr):
    n = pl.program_id(0)
    H, _ = h_scr.shape
    lengths = _lstm_recurrence(tmax_ref[n], x_ref, len_ref,
                               wih_f, whh_f, b_f, h_scr, c_scr, gx_scr)
    nonzero = lengths > 0
    out_ref[0:H, :] = jnp.where(nonzero, h_scr[...], 0.0)

    # Reverse direction of a packed biLSTM at the last valid character:
    # one LSTM step from the zero state -> no h @ W_hh, no forget gate.
    # wih_b / b_b are forget-gate-stripped: rows [i, g, o] of size H each.
    gb = (jnp.dot(wih_b[...], xlast_ref[...],
                  preferred_element_type=jnp.float32) + b_b[...])   # [3H, TN]
    i_b = _sigmoid(gb[0 * H:1 * H])
    g_b = jnp.tanh(gb[1 * H:2 * H])
    o_b = _sigmoid(gb[2 * H:3 * H])
    out_ref[H:2 * H, :] = jnp.where(nonzero, o_b * jnp.tanh(i_b * g_b), 0.0)


def _char_lstm_kernel_uni(tmax_ref, x_ref, len_ref, wih_f, whh_f, b_f,
                          out_ref, h_scr, c_scr, gx_scr):
    n = pl.program_id(0)
    lengths = _lstm_recurrence(tmax_ref[n], x_ref, len_ref,
                               wih_f, whh_f, b_f, h_scr, c_scr, gx_scr)
    out_ref[...] = jnp.where(lengths > 0, h_scr[...], 0.0)


# ---------------------------------------------------------------------------
# Parameters (deterministic synthetic init, PyTorch-shaped)
# ---------------------------------------------------------------------------
def init_char_embed_params(key, alphabet_size, char_embed_dim, char_lstm_dim,
                           bidirectional):
    hidden = char_lstm_dim // 2 if bidirectional else char_lstm_dim
    ks = jax.random.split(key, 3)
    emb = jax.random.normal(ks[0], (alphabet_size, char_embed_dim), jnp.float32)
    scale = 1.0 / (hidden ** 0.5)

    def lstm_dir(k):
        kk = jax.random.split(k, 4)
        return dict(
            w_ih=jax.random.uniform(kk[0], (4 * hidden, char_embed_dim),
                                    jnp.float32, -scale, scale),
            w_hh=jax.random.uniform(kk[1], (4 * hidden, hidden),
                                    jnp.float32, -scale, scale),
            b_ih=jax.random.uniform(kk[2], (4 * hidden,), jnp.float32, -scale, scale),
            b_hh=jax.random.uniform(kk[3], (4 * hidden,), jnp.float32, -scale, scale),
        )

    params = dict(embedding=emb, fwd=lstm_dir(ks[1]), hidden=hidden,
                  bidirectional=bidirectional)
    if bidirectional:
        params["bwd"] = lstm_dir(ks[2])
    return params


def _fused_dir_weights(d):
    # PyTorch LSTM weights are gate-stacked [i, f, g, o] along dim 0:
    # keep them fused so the whole-time-block projection is one matmul.
    w_ih = d["w_ih"].astype(jnp.bfloat16)                   # [4H, E]
    w_hh = d["w_hh"].astype(jnp.bfloat16)                   # [4H, H]
    b = (d["b_ih"] + d["b_hh"])[:, None].astype(jnp.float32)  # [4H, 1]
    return w_ih, w_hh, b


def _stripped_bwd_weights(d, hidden):
    # The reverse single-step from zero state never uses the forget gate:
    # keep only [i, g, o] rows -> [3H, E] / [3H, 1].
    keep = jnp.concatenate([jnp.arange(0, hidden),
                            jnp.arange(2 * hidden, 4 * hidden)])
    w_ih = d["w_ih"][keep].astype(jnp.bfloat16)                      # [3H, E]
    b = (d["b_ih"] + d["b_hh"])[keep][:, None].astype(jnp.float32)   # [3H, 1]
    return w_ih, b


def _pick_tile_n(n_words, requested):
    n128 = max(128, ((n_words + 127) // 128) * 128)
    tn = max(128, (min(requested, n128) // 128) * 128)
    # v7x has 2 TensorCores: prefer >= 2 word tiles when the batch allows it.
    if n128 >= 256 and ((n_words + tn - 1) // tn) < 2:
        tn = max(128, ((n128 // 2) // 128) * 128)
    return tn


# ---------------------------------------------------------------------------
# Forward wrapper (mirrors CharEmbed.forward(input, charEmbed))
# ---------------------------------------------------------------------------
def char_embed_forward(input_unused, char_embed, params, *, tile_n=256):
    del input_unused  # `input` is unused by the reference forward as well.
    n_words, max_t = char_embed.shape
    emb = params["embedding"]
    E = emb.shape[1]
    H = params["hidden"]
    bidirectional = params["bidirectional"]

    lengths = jnp.sum(char_embed > 0, axis=1).astype(jnp.int32)      # [N]

    # Sort words by descending length (pack_padded_sequence analogue) so the
    # per-tile time bound is tight; the permutation is undone after the kernel.
    order = jnp.argsort(-lengths)
    inv_order = jnp.argsort(order)
    ids_sorted = char_embed[order]
    len_sorted = lengths[order]

    tn = _pick_tile_n(n_words, tile_n)
    n_tiles = -(-n_words // tn)
    n_pad = n_tiles * tn
    pad = n_pad - n_words
    TTN = max_t * tn
    H4 = 4 * H

    # Embedding lookup stays as an XLA gather; bf16 feeds the MXU natively.
    # TODO(synk): for very long T, time-block the x slab (grid=(n_tiles, T/T_BLK))
    # to bound the gx scratch; character words are short so full-T is kept here.
    embedded = jnp.take(emb.astype(jnp.bfloat16), ids_sorted, axis=0)  # [N,T,E]

    # Contiguous per-tile x blocks: [n_tiles, E, T*tile_n]  (one slab per DMA).
    x = jnp.pad(embedded, ((0, pad), (0, 0), (0, 0)))                  # [Np,T,E]
    x = x.reshape(n_tiles, tn, max_t, E)
    x = jnp.transpose(x, (0, 3, 2, 1)).reshape(n_tiles, E, TTN)

    len_pad = jnp.pad(len_sorted, (0, pad))
    len_row = len_pad[None, :]                                         # [1, Np]
    tile_max = jnp.max(len_pad.reshape(n_tiles, tn), axis=1).astype(jnp.int32)

    wih_f, whh_f, b_f = _fused_dir_weights(params["fwd"])

    grid = (n_tiles,)
    x_spec = pl.BlockSpec((None, E, TTN), lambda n, tm: (n, 0, 0))
    len_spec = pl.BlockSpec((1, tn), lambda n, tm: (0, n))
    wih_spec = pl.BlockSpec((H4, E), lambda n, tm: (0, 0))
    whh_spec = pl.BlockSpec((H4, H), lambda n, tm: (0, 0))
    b_spec = pl.BlockSpec((H4, 1), lambda n, tm: (0, 0))
    scratch = [pltpu.VMEM((H, tn), jnp.float32),        # h
               pltpu.VMEM((H, tn), jnp.float32),        # c
               pltpu.VMEM((H4, TTN), jnp.float32)]      # whole-block gx
    # TODO(synk): at production H, single-buffer the grid-invariant weight
    # specs (pipeline_mode=pl.Buffered(1)) to save VMEM on v7x (64 MiB).
    cparams = pltpu.CompilerParams(
        dimension_semantics=("parallel",),
        vmem_limit_bytes=48 * 1024 * 1024)  # v5e scoped default is only 16 MiB

    if bidirectional:
        eff = jnp.maximum(len_sorted, 1)
        x_last = embedded[jnp.arange(n_words), eff - 1]                # [N, E]
        x_last = jnp.pad(x_last, ((0, pad), (0, 0))).T                 # [E, Np]
        wih_b3, b_b3 = _stripped_bwd_weights(params["bwd"], H)
        xlast_spec = pl.BlockSpec((E, tn), lambda n, tm: (0, n))
        wihb_spec = pl.BlockSpec((3 * H, E), lambda n, tm: (0, 0))
        bb_spec = pl.BlockSpec((3 * H, 1), lambda n, tm: (0, 0))
        out_spec = pl.BlockSpec((2 * H, tn), lambda n, tm: (0, n))
        out = pl.pallas_call(
            _char_lstm_kernel_bi,
            grid_spec=pltpu.PrefetchScalarGridSpec(
                num_scalar_prefetch=1,
                grid=grid,
                in_specs=[x_spec, xlast_spec, len_spec,
                          wih_spec, whh_spec, b_spec, wihb_spec, bb_spec],
                out_specs=out_spec,
                scratch_shapes=scratch),
            out_shape=jax.ShapeDtypeStruct((2 * H, n_pad), jnp.float32),
            compiler_params=cparams,
        )(tile_max, x, x_last, len_row, wih_f, whh_f, b_f, wih_b3, b_b3)
    else:
        out_spec = pl.BlockSpec((H, tn), lambda n, tm: (0, n))
        out = pl.pallas_call(
            _char_lstm_kernel_uni,
            grid_spec=pltpu.PrefetchScalarGridSpec(
                num_scalar_prefetch=1,
                grid=grid,
                in_specs=[x_spec, len_spec, wih_spec, whh_spec, b_spec],
                out_specs=out_spec,
                scratch_shapes=scratch),
            out_shape=jax.ShapeDtypeStruct((H, n_pad), jnp.float32),
            compiler_params=cparams,
        )(tile_max, x, len_row, wih_f, whh_f, b_f)

    # Un-sort (also drops the tile padding rows).
    return out.T[inv_order]


# ---------------------------------------------------------------------------
# Pure-JAX f32 reference (same semantics) for a correctness check
# ---------------------------------------------------------------------------
def char_embed_forward_ref(char_embed, params):
    n_words, _ = char_embed.shape
    hidden = params["hidden"]
    lengths = jnp.sum(char_embed > 0, axis=1).astype(jnp.int32)
    eff_len = jnp.maximum(lengths, 1)
    embedded = jnp.take(params["embedding"], char_embed, axis=0)

    def lstm_cell(x_t, h, c, d):
        gates = x_t @ d["w_ih"].T + h @ d["w_hh"].T + d["b_ih"] + d["b_hh"]
        i, f, g, o = jnp.split(gates, 4, axis=-1)
        c_new = jax.nn.sigmoid(f) * c + jax.nn.sigmoid(i) * jnp.tanh(g)
        h_new = jax.nn.sigmoid(o) * jnp.tanh(c_new)
        return h_new, c_new

    h0 = jnp.zeros((n_words, hidden), jnp.float32)
    c0 = jnp.zeros((n_words, hidden), jnp.float32)

    def scan_fn(carry, x_t):
        h, c, t = carry
        h_new, c_new = lstm_cell(x_t, h, c, params["fwd"])
        active = (t < eff_len)[:, None]
        return (jnp.where(active, h_new, h), jnp.where(active, c_new, c), t + 1), None

    (h_f, _, _), _ = lax.scan(scan_fn, (h0, c0, 0), jnp.transpose(embedded, (1, 0, 2)))
    nonzero = (lengths > 0)[:, None].astype(jnp.float32)
    out = h_f * nonzero
    if params["bidirectional"]:
        x_last = embedded[jnp.arange(n_words), eff_len - 1]
        h_b, _ = lstm_cell(x_last, h0, c0, params["bwd"])
        out = jnp.concatenate([out, h_b * nonzero], axis=-1)
    return out


# ---------------------------------------------------------------------------
if __name__ == "__main__":
    alphabet_size = 20
    char_embed_dim = 8
    n_words, max_chars = 8, 6

    key = jax.random.PRNGKey(0)
    k_param, k_chars, k_input = jax.random.split(key, 3)

    # Character-id matrix, 0 = padding (padding at the tail, one empty word).
    true_lengths = jnp.array([3, 6, 1, 0, 4, 2, 5, 6], dtype=jnp.int32)
    chars = jax.random.randint(k_chars, (n_words, max_chars), 1, alphabet_size,
                               dtype=jnp.int32)
    cols = jnp.arange(max_chars, dtype=jnp.int32)[None, :]
    char_embed_ids = jnp.where(cols < true_lengths[:, None], chars, 0)

    # `input` argument of the reference module is unused; keep it for signature parity.
    dummy_input = jax.random.normal(k_input, (n_words, 4), jnp.float32)

    # --- bidirectional case (charLstmDim split across directions) ---
    char_lstm_dim = 16
    params_bi = init_char_embed_params(k_param, alphabet_size, char_embed_dim,
                                       char_lstm_dim, bidirectional=True)
    out_bi = char_embed_forward(dummy_input, char_embed_ids, params_bi)
    out_bi = jax.block_until_ready(out_bi)
    ref_bi = char_embed_forward_ref(char_embed_ids, params_bi)
    assert out_bi.shape == (n_words, char_lstm_dim), out_bi.shape
    assert bool(jnp.all(out_bi[3] == 0.0))             # zero-length word is zeroed
    # bf16 x / weights in the kernel vs f32 reference -> loosened tolerance.
    assert bool(jnp.allclose(out_bi, ref_bi, atol=3e-2, rtol=3e-2))

    # --- unidirectional case ---
    params_uni = init_char_embed_params(k_param, alphabet_size, char_embed_dim,
                                        8, bidirectional=False)
    out_uni = char_embed_forward(dummy_input, char_embed_ids, params_uni)
    out_uni = jax.block_until_ready(out_uni)
    ref_uni = char_embed_forward_ref(char_embed_ids, params_uni)
    assert out_uni.shape == (n_words, 8), out_uni.shape
    assert bool(jnp.all(out_uni[3] == 0.0))
    assert bool(jnp.allclose(out_uni, ref_uni, atol=3e-2, rtol=3e-2))

    print("KERNEL_OK")
</pallas_src>

<mosaic_0001>
module attributes {stable_mosaic.version = 11 : i64} {
  func.func @_char_lstm_kernel_bi(%arg0: i32, %arg1: memref<1xi32, #tpu.memory_space<smem>>, %arg2: memref<1x8x768xbf16, #tpu.memory_space<vmem>>, %arg3: memref<8x128xbf16, #tpu.memory_space<vmem>>, %arg4: memref<1x128xi32, #tpu.memory_space<vmem>>, %arg5: memref<32x8xbf16, #tpu.memory_space<vmem>>, %arg6: memref<32x8xbf16, #tpu.memory_space<vmem>>, %arg7: memref<32x1xf32, #tpu.memory_space<vmem>>, %arg8: memref<24x8xbf16, #tpu.memory_space<vmem>>, %arg9: memref<24x1xf32, #tpu.memory_space<vmem>>, %arg10: memref<16x128xf32, #tpu.memory_space<vmem>>, %arg11: memref<8x128xf32, #tpu.memory_space<vmem>>, %arg12: memref<8x128xf32, #tpu.memory_space<vmem>>, %arg13: memref<32x768xf32, #tpu.memory_space<vmem>>) attributes {dimension_semantics = [#tpu.dimension_semantics<parallel>], iteration_bounds = array<i64: 1>, scalar_prefetch = 1 : i64, scratch_operands = 3 : i64, tpu.core_type = #tpu.core_type<tc>, window_params = [{transform_indices = @transform_0, window_bounds = array<i64: 1, 8, 768>}, {transform_indices = @transform_1, window_bounds = array<i64: 8, 128>}, {transform_indices = @transform_2, window_bounds = array<i64: 1, 128>}, {pipeline_mode = #tpu.pipeline_mode<synchronous>, transform_indices = @transform_3, window_bounds = array<i64: 32, 8>}, {pipeline_mode = #tpu.pipeline_mode<synchronous>, transform_indices = @transform_4, window_bounds = array<i64: 32, 8>}, {pipeline_mode = #tpu.pipeline_mode<synchronous>, transform_indices = @transform_5, window_bounds = array<i64: 32, 1>}, {pipeline_mode = #tpu.pipeline_mode<synchronous>, transform_indices = @transform_6, window_bounds = array<i64: 24, 8>}, {pipeline_mode = #tpu.pipeline_mode<synchronous>, transform_indices = @transform_7, window_bounds = array<i64: 24, 1>}, {transform_indices = @transform_8, window_bounds = array<i64: 16, 128>}]} {
    %0 = arith.index_cast %arg0 : i32 to index
    %1 = memref.load %arg1[%0] : memref<1xi32, #tpu.memory_space<smem>>
    %c0 = arith.constant 0 : index
    %c0_0 = arith.constant 0 : index
    %2 = vector.load %arg5[%c0, %c0_0] : memref<32x8xbf16, #tpu.memory_space<vmem>>, vector<32x8xbf16>
    %c0_1 = arith.constant 0 : index
    %c0_2 = arith.constant 0 : index
    %c0_3 = arith.constant 0 : index
    %3 = vector.load %arg2[%c0_1, %c0_2, %c0_3] : memref<1x8x768xbf16, #tpu.memory_space<vmem>>, vector<1x8x768xbf16>
    %4 = vector.shape_cast %3 : vector<1x8x768xbf16> to vector<8x768xbf16>
    %cst = arith.constant dense<0.000000e+00> : vector<32x768xf32>
    %5 = tpu.matmul %2, %4, %cst {dimension_numbers = #tpu.dot_dimension_numbers<[1], [0], [0], [1], [0, 0, 1, 1], [], []>} : vector<32x8xbf16>, vector<8x768xbf16>, vector<32x768xf32> -> vector<32x768xf32>
    %c0_4 = arith.constant 0 : index
    %c0_5 = arith.constant 0 : index
    %6 = vector.load %arg7[%c0_4, %c0_5] : memref<32x1xf32, #tpu.memory_space<vmem>>, vector<32x1xf32>
    %7 = vector.broadcast %6 : vector<32x1xf32> to vector<32x768xf32>
    %8 = arith.addf %5, %7 : vector<32x768xf32>
    %c0_6 = arith.constant 0 : index
    %c0_7 = arith.constant 0 : index
    %9 = vector.load %arg13[%c0_6, %c0_7] : memref<32x768xf32, #tpu.memory_space<vmem>>, vector<32x768xf32>
    tpu.vector_store %arg13[%c0_6, %c0_7], %8 {strides = array<i32>} : memref<32x768xf32, #tpu.memory_space<vmem>>, vector<32x768xf32>,
    %cst_8 = arith.constant 0.000000e+00 : f32
    %10 = vector.broadcast %cst_8 : f32 to vector<8x128xf32>
    %c0_9 = arith.constant 0 : index
    %c0_10 = arith.constant 0 : index
    %11 = vector.load %arg11[%c0_9, %c0_10] : memref<8x128xf32, #tpu.memory_space<vmem>>, vector<8x128xf32>
    tpu.vector_store %arg11[%c0_9, %c0_10], %10 {strides = array<i32>} : memref<8x128xf32, #tpu.memory_space<vmem>>, vector<8x128xf32>,
    %cst_11 = arith.constant 0.000000e+00 : f32
    %12 = vector.broadcast %cst_11 : f32 to vector<8x128xf32>
    %c0_12 = arith.constant 0 : index
    %c0_13 = arith.constant 0 : index
    %13 = vector.load %arg12[%c0_12, %c0_13] : memref<8x128xf32, #tpu.memory_space<vmem>>, vector<8x128xf32>
    tpu.vector_store %arg12[%c0_12, %c0_13], %12 {strides = array<i32>} : memref<8x128xf32, #tpu.memory_space<vmem>>, vector<8x128xf32>,
    %c0_14 = arith.constant 0 : index
    %c0_15 = arith.constant 0 : index
    %14 = vector.load %arg4[%c0_14, %c0_15] : memref<1x128xi32, #tpu.memory_space<vmem>>, vector<1x128xi32>
    %c0_16 = arith.constant 0 : index
    %c0_17 = arith.constant 0 : index
    %15 = vector.load %arg6[%c0_16, %c0_17] : memref<32x8xbf16, #tpu.memory_space<vmem>>, vector<32x8xbf16>
    %c0_i32 = arith.constant 0 : i32
    %16 = arith.cmpi sgt, %1, %c0_i32 : i32
    %17 = arith.extui %16 : i1 to i32
    %c0_i32_18 = arith.constant 0 : i32
    %18 = arith.cmpi ne, %17, %c0_i32_18 : i32
    scf.if %18 {
      %c0_45 = arith.constant 0 : index
      %c0_46 = arith.constant 0 : index
      %74 = vector.load %arg11[%c0_45, %c0_46] : memref<8x128xf32, #tpu.memory_space<vmem>>, vector<8x128xf32>
      %c0_47 = arith.constant 0 : index
      %c0_48 = arith.constant 0 : index
      %75 = vector.load %arg12[%c0_47, %c0_48] : memref<8x128xf32, #tpu.memory_space<vmem>>, vector<8x128xf32>
      %c0_49 = arith.constant 0 : index
      %c0_50 = arith.constant 0 : index
      %76 = vector.load %arg13[%c0_49, %c0_50] : memref<32x768xf32, #tpu.memory_space<vmem>>, vector<32x128xf32>
      %77 = arith.truncf %74 : vector<8x128xf32> to vector<8x128xbf16>
      %cst_51 = arith.constant dense<0.000000e+00> : vector<32x128xf32>
      %78 = tpu.matmul %15, %77, %cst_51 {dimension_numbers = #tpu.dot_dimension_numbers<[1], [0], [0], [1], [0, 0, 1, 1], [], []>} : vector<32x8xbf16>, vector<8x128xbf16>, vector<32x128xf32> -> vector<32x128xf32>
      %79 = arith.addf %76, %78 : vector<32x128xf32>
      %80 = vector.extract_strided_slice %79 {offsets = [0, 0], sizes = [8, 128], strides = [1, 1]} : vector<32x128xf32> to vector<8x128xf32>
      %cst_52 = arith.constant 5.000000e-01 : f32
      %81 = vector.broadcast %cst_52 : f32 to vector<8x128xf32>
      %82 = arith.mulf %81, %80 : vector<8x128xf32>
      %83 = math.tanh %82 : vector<8x128xf32>
      %cst_53 = arith.constant 5.000000e-01 : f32
      %84 = vector.broadcast %cst_53 : f32 to vector<8x128xf32>
      %85 = arith.mulf %84, %83 : vector<8x128xf32>
      %cst_54 = arith.constant 5.000000e-01 : f32
      %86 = vector.broadcast %cst_54 : f32 to vector<8x128xf32>
      %87 = arith.addf %85, %86 : vector<8x128xf32>
      %88 = vector.extract_strided_slice %79 {offsets = [8, 0], sizes = [8, 128], strides = [1, 1]} : vector<32x128xf32> to vector<8x128xf32>
      %cst_55 = arith.constant 5.000000e-01 : f32
      %89 = vector.broadcast %cst_55 : f32 to vector<8x128xf32>
      %90 = arith.mulf %89, %88 : vector<8x128xf32>
      %91 = math.tanh %90 : vector<8x128xf32>
      %cst_56 = arith.constant 5.000000e-01 : f32
      %92 = vector.broadcast %cst_56 : f32 to vector<8x128xf32>
      %93 = arith.mulf %92, %91 : vector<8x128xf32>
      %cst_57 = arith.constant 5.000000e-01 : f32
      %94 = vector.broadcast %cst_57 : f32 to vector<8x128xf32>
      %95 = arith.addf %93, %94 : vector<8x128xf32>
      %96 = vector.extract_strided_slice %79 {offsets = [16, 0], sizes = [8, 128], strides = [1, 1]} : vector<32x128xf32> to vector<8x128xf32>
      %97 = math.tanh %96 : vector<8x128xf32>
      %98 = vector.extract_strided_slice %79 {offsets = [24, 0], sizes = [8, 128], strides = [1, 1]} : vector<32x128xf32> to vector<8x128xf32>
      %cst_58 = arith.constant 5.000000e-01 : f32
      %99 = vector.broadcast %cst_58 : f32 to vector<8x128xf32>
      %100 = arith.mulf %99, %98 : vector<8x128xf32>
      %101 = math.tanh %100 : vector<8x128xf32>
      %cst_59 = arith.constant 5.000000e-01 : f32
      %102 = vector.broadcast %cst_59 : f32 to vector<8x128xf32>
      %103 = arith.mulf %102, %101 : vector<8x128xf32>
      %cst_60 = arith.constant 5.000000e-01 : f32
      %104 = vector.broadcast %cst_60 : f32 to vector<8x128xf32>
      %105 = arith.addf %103, %104 : vector<8x128xf32>
      %106 = arith.mulf %95, %75 : vector<8x128xf32>
      %107 = arith.mulf %87, %97 : vector<8x128xf32>
      %108 = arith.addf %106, %107 : vector<8x128xf32>
      %109 = math.tanh %108 : vector<8x128xf32>
      %110 = arith.mulf %105, %109 : vector<8x128xf32>
      %c0_i32_61 = arith.constant 0 : i32
      %111 = vector.broadcast %c0_i32_61 : i32 to vector<1x128xi32>
      %112 = arith.cmpi sgt, %14, %111 : vector<1x128xi32>
      %113 = vector.shape_cast %112 : vector<1x128xi1> to vector<1x128xi1>
      %114 = vector.broadcast %113 : vector<1x128xi1> to vector<8x128xi1>
      %115 = arith.select %114, %110, %74 : vector<8x128xi1>, vector<8x128xf32>
      %c0_62 = arith.constant 0 : index
      %c0_63 = arith.constant 0 : index
      %116 = vector.load %arg11[%c0_62, %c0_63] : memref<8x128xf32, #tpu.memory_space<vmem>>, vector<8x128xf32>
      tpu.vector_store %arg11[%c0_62, %c0_63], %115 {strides = array<i32>} : memref<8x128xf32, #tpu.memory_space<vmem>>, vector<8x128xf32>,
      %117 = vector.shape_cast %112 : vector<1x128xi1> to vector<1x128xi1>
      %118 = vector.broadcast %117 : vector<1x128xi1> to vector<8x128xi1>
      %119 = arith.select %118, %108, %75 : vector<8x128xi1>, vector<8x128xf32>
      %c0_64 = arith.constant 0 : index
      %c0_65 = arith.constant 0 : index
      %120 = vector.load %arg12[%c0_64, %c0_65] : memref<8x128xf32, #tpu.memory_space<vmem>>, vector<8x128xf32>
      tpu.vector_store %arg12[%c0_64, %c0_65], %119 {strides = array<i32>} : memref<8x128xf32, #tpu.memory_space<vmem>>, vector<8x128xf32>,
    } else {
    }
    %c1_i32 = arith.constant 1 : i32
    %19 = arith.cmpi sgt, %1, %c1_i32 : i32
    %20 = arith.extui %19 : i1 to i32
    %c0_i32_19 = arith.constant 0 : i32
    %21 = arith.cmpi ne, %20, %c0_i32_19 : i32
    scf.if %21 {
      %c0_45 = arith.constant 0 : index
      %c0_46 = arith.constant 0 : index
      %74 = vector.load %arg11[%c0_45, %c0_46] : memref<8x128xf32, #tpu.memory_space<vmem>>, vector<8x128xf32>
      %c0_47 = arith.constant 0 : index
      %c0_48 = arith.constant 0 : index
      %75 = vector.load %arg12[%c0_47, %c0_48] : memref<8x128xf32, #tpu.memory_space<vmem>>, vector<8x128xf32>
      %c0_49 = arith.constant 0 : index
      %c128 = arith.constant 128 : index
      %76 = vector.load %arg13[%c0_49, %c128] : memref<32x768xf32, #tpu.memory_space<vmem>>, vector<32x128xf32>
      %77 = arith.truncf %74 : vector<8x128xf32> to vector<8x128xbf16>
      %cst_50 = arith.constant dense<0.000000e+00> : vector<32x128xf32>
      %78 = tpu.matmul %15, %77, %cst_50 {dimension_numbers = #tpu.dot_dimension_numbers<[1], [0], [0], [1], [0, 0, 1, 1], [], []>} : vector<32x8xbf16>, vector<8x128xbf16>, vector<32x128xf32> -> vector<32x128xf32>
      %79 = arith.addf %76, %78 : vector<32x128xf32>
      %80 = vector.extract_strided_slice %79 {offsets = [0, 0], sizes = [8, 128], strides = [1, 1]} : vector<32x128xf32> to vector<8x128xf32>
      %cst_51 = arith.constant 5.000000e-01 : f32
      %81 = vector.broadcast %cst_51 : f32 to vector<8x128xf32>
      %82 = arith.mulf %81, %80 : vector<8x128xf32>
      %83 = math.tanh %82 : vector<8x128xf32>
      %cst_52 = arith.constant 5.000000e-01 : f32
      %84 = vector.broadcast %cst_52 : f32 to vector<8x128xf32>
      %85 = arith.mulf %84, %83 : vector<8x128xf32>
      %cst_53 = arith.constant 5.000000e-01 : f32
      %86 = vector.broadcast %cst_53 : f32 to vector<8x128xf32>
      %87 = arith.addf %85, %86 : vector<8x128xf32>
      %88 = vector.extract_strided_slice %79 {offsets = [8, 0], sizes = [8, 128], strides = [1, 1]} : vector<32x128xf32> to vector<8x128xf32>
      %cst_54 = arith.constant 5.000000e-01 : f32
      %89 = vector.broadcast %cst_54 : f32 to vector<8x128xf32>
      %90 = arith.mulf %89, %88 : vector<8x128xf32>
      %91 = math.tanh %90 : vector<8x128xf32>
      %cst_55 = arith.constant 5.000000e-01 : f32
      %92 = vector.broadcast %cst_55 : f32 to vector<8x128xf32>
      %93 = arith.mulf %92, %91 : vector<8x128xf32>
      %cst_56 = arith.constant 5.000000e-01 : f32
      %94 = vector.broadcast %cst_56 : f32 to vector<8x128xf32>
      %95 = arith.addf %93, %94 : vector<8x128xf32>
      %96 = vector.extract_strided_slice %79 {offsets = [16, 0], sizes = [8, 128], strides = [1, 1]} : vector<32x128xf32> to vector<8x128xf32>
      %97 = math.tanh %96 : vector<8x128xf32>
      %98 = vector.extract_strided_slice %79 {offsets = [24, 0], sizes = [8, 128], strides = [1, 1]} : vector<32x128xf32> to vector<8x128xf32>
      %cst_57 = arith.constant 5.000000e-01 : f32
      %99 = vector.broadcast %cst_57 : f32 to vector<8x128xf32>
      %100 = arith.mulf %99, %98 : vector<8x128xf32>
      %101 = math.tanh %100 : vector<8x128xf32>
      %cst_58 = arith.constant 5.000000e-01 : f32
      %102 = vector.broadcast %cst_58 : f32 to vector<8x128xf32>
      %103 = arith.mulf %102, %101 : vector<8x128xf32>
      %cst_59 = arith.constant 5.000000e-01 : f32
      %104 = vector.broadcast %cst_59 : f32 to vector<8x128xf32>
      %105 = arith.addf %103, %104 : vector<8x128xf32>
      %106 = arith.mulf %95, %75 : vector<8x128xf32>
      %107 = arith.mulf %87, %97 : vector<8x128xf32>
      %108 = arith.addf %106, %107 : vector<8x128xf32>
      %109 = math.tanh %108 : vector<8x128xf32>
      %110 = arith.mulf %105, %109 : vector<8x128xf32>
      %c1_i32_60 = arith.constant 1 : i32
      %111 = vector.broadcast %c1_i32_60 : i32 to vector<1x128xi32>
      %112 = arith.cmpi sgt, %14, %111 : vector<1x128xi32>
      %113 = vector.shape_cast %112 : vector<1x128xi1> to vector<1x128xi1>
      %114 = vector.broadcast %113 : vector<1x128xi1> to vector<8x128xi1>
      %115 = arith.select %114, %110, %74 : vector<8x128xi1>, vector<8x128xf32>
      %c0_61 = arith.constant 0 : index
      %c0_62 = arith.constant 0 : index
      %116 = vector.load %arg11[%c0_61, %c0_62] : memref<8x128xf32, #tpu.memory_space<vmem>>, vector<8x128xf32>
      tpu.vector_store %arg11[%c0_61, %c0_62], %115 {strides = array<i32>} : memref<8x128xf32, #tpu.memory_space<vmem>>, vector<8x128xf32>,
      %117 = vector.shape_cast %112 : vector<1x128xi1> to vector<1x128xi1>
      %118 = vector.broadcast %117 : vector<1x128xi1> to vector<8x128xi1>
      %119 = arith.select %118, %108, %75 : vector<8x128xi1>, vector<8x128xf32>
      %c0_63 = arith.constant 0 : index
      %c0_64 = arith.constant 0 : index
      %120 = vector.load %arg12[%c0_63, %c0_64] : memref<8x128xf32, #tpu.memory_space<vmem>>, vector<8x128xf32>
      tpu.vector_store %arg12[%c0_63, %c0_64], %119 {strides = array<i32>} : memref<8x128xf32, #tpu.memory_space<vmem>>, vector<8x128xf32>,
    } else {
    }
    %c2_i32 = arith.constant 2 : i32
    %22 = arith.cmpi sgt, %1, %c2_i32 : i32
    %23 = arith.extui %22 : i1 to i32
    %c0_i32_20 = arith.constant 0 : i32
    %24 = arith.cmpi ne, %23, %c0_i32_20 : i32
    scf.if %24 {
      %c0_45 = arith.constant 0 : index
      %c0_46 = arith.constant 0 : index
      %74 = vector.load %arg11[%c0_45, %c0_46] : memref<8x128xf32, #tpu.memory_space<vmem>>, vector<8x128xf32>
      %c0_47 = arith.constant 0 : index
      %c0_48 = arith.constant 0 : index
      %75 = vector.load %arg12[%c0_47, %c0_48] : memref<8x128xf32, #tpu.memory_space<vmem>>, vector<8x128xf32>
      %c0_49 = arith.constant 0 : index
      %c256 = arith.constant 256 : index
      %76 = vector.load %arg13[%c0_49, %c256] : memref<32x768xf32, #tpu.memory_space<vmem>>, vector<32x128xf32>
      %77 = arith.truncf %74 : vector<8x128xf32> to vector<8x128xbf16>
      %cst_50 = arith.constant dense<0.000000e+00> : vector<32x128xf32>
      %78 = tpu.matmul %15, %77, %cst_50 {dimension_numbers = #tpu.dot_dimension_numbers<[1], [0], [0], [1], [0, 0, 1, 1], [], []>} : vector<32x8xbf16>, vector<8x128xbf16>, vector<32x128xf32> -> vector<32x128xf32>
      %79 = arith.addf %76, %78 : vector<32x128xf32>
      %80 = vector.extract_strided_slice %79 {offsets = [0, 0], sizes = [8, 128], strides = [1, 1]} : vector<32x128xf32> to vector<8x128xf32>
      %cst_51 = arith.constant 5.000000e-01 : f32
      %81 = vector.broadcast %cst_51 : f32 to vector<8x128xf32>
      %82 = arith.mulf %81, %80 : vector<8x128xf32>
      %83 = math.tanh %82 : vector<8x128xf32>
      %cst_52 = arith.constant 5.000000e-01 : f32
      %84 = vector.broadcast %cst_52 : f32 to vector<8x128xf32>
      %85 = arith.mulf %84, %83 : vector<8x128xf32>
      %cst_53 = arith.constant 5.000000e-01 : f32
      %86 = vector.broadcast %cst_53 : f32 to vector<8x128xf32>
      %87 = arith.addf %85, %86 : vector<8x128xf32>
      %88 = vector.extract_strided_slice %79 {offsets = [8, 0], sizes = [8, 128], strides = [1, 1]} : vector<32x128xf32> to vector<8x128xf32>
      %cst_54 = arith.constant 5.000000e-01 : f32
      %89 = vector.broadcast %cst_54 : f32 to vector<8x128xf32>
      %90 = arith.mulf %89, %88 : vector<8x128xf32>
      %91 = math.tanh %90 : vector<8x128xf32>
      %cst_55 = arith.constant 5.000000e-01 : f32
      %92 = vector.broadcast %cst_55 : f32 to vector<8x128xf32>
      %93 = arith.mulf %92, %91 : vector<8x128xf32>
      %cst_56 = arith.constant 5.000000e-01 : f32
      %94 = vector.broadcast %cst_56 : f32 to vector<8x128xf32>
      %95 = arith.addf %93, %94 : vector<8x128xf32>
      %96 = vector.extract_strided_slice %79 {offsets = [16, 0], sizes = [8, 128], strides = [1, 1]} : vector<32x128xf32> to vector<8x128xf32>
      %97 = math.tanh %96 : vector<8x128xf32>
      %98 = vector.extract_strided_slice %79 {offsets = [24, 0], sizes = [8, 128], strides = [1, 1]} : vector<32x128xf32> to vector<8x128xf32>
      %cst_57 = arith.constant 5.000000e-01 : f32
      %99 = vector.broadcast %cst_57 : f32 to vector<8x128xf32>
      %100 = arith.mulf %99, %98 : vector<8x128xf32>
      %101 = math.tanh %100 : vector<8x128xf32>
      %cst_58 = arith.constant 5.000000e-01 : f32
      %102 = vector.broadcast %cst_58 : f32 to vector<8x128xf32>
      %103 = arith.mulf %102, %101 : vector<8x128xf32>
      %cst_59 = arith.constant 5.000000e-01 : f32
      %104 = vector.broadcast %cst_59 : f32 to vector<8x128xf32>
      %105 = arith.addf %103, %104 : vector<8x128xf32>
      %106 = arith.mulf %95, %75 : vector<8x128xf32>
      %107 = arith.mulf %87, %97 : vector<8x128xf32>
      %108 = arith.addf %106, %107 : vector<8x128xf32>
      %109 = math.tanh %108 : vector<8x128xf32>
      %110 = arith.mulf %105, %109 : vector<8x128xf32>
      %c2_i32_60 = arith.constant 2 : i32
      %111 = vector.broadcast %c2_i32_60 : i32 to vector<1x128xi32>
      %112 = arith.cmpi sgt, %14, %111 : vector<1x128xi32>
      %113 = vector.shape_cast %112 : vector<1x128xi1> to vector<1x128xi1>
      %114 = vector.broadcast %113 : vector<1x128xi1> to vector<8x128xi1>
      %115 = arith.select %114, %110, %74 : vector<8x128xi1>, vector<8x128xf32>
      %c0_61 = arith.constant 0 : index
      %c0_62 = arith.constant 0 : index
      %116 = vector.load %arg11[%c0_61, %c0_62] : memref<8x128xf32, #tpu.memory_space<vmem>>, vector<8x128xf32>
      tpu.vector_store %arg11[%c0_61, %c0_62], %115 {strides = array<i32>} : memref<8x128xf32, #tpu.memory_space<vmem>>, vector<8x128xf32>,
      %117 = vector.shape_cast %112 : vector<1x128xi1> to vector<1x128xi1>
      %118 = vector.broadcast %117 : vector<1x128xi1> to vector<8x128xi1>
      %119 = arith.select %118, %108, %75 : vector<8x128xi1>, vector<8x128xf32>
      %c0_63 = arith.constant 0 : index
      %c0_64 = arith.constant 0 : index
      %120 = vector.load %arg12[%c0_63, %c0_64] : memref<8x128xf32, #tpu.memory_space<vmem>>, vector<8x128xf32>
      tpu.vector_store %arg12[%c0_63, %c0_64], %119 {strides = array<i32>} : memref<8x128xf32, #tpu.memory_space<vmem>>, vector<8x128xf32>,
    } else {
    }
    %c3_i32 = arith.constant 3 : i32
    %25 = arith.cmpi sgt, %1, %c3_i32 : i32
    %26 = arith.extui %25 : i1 to i32
    %c0_i32_21 = arith.constant 0 : i32
    %27 = arith.cmpi ne, %26, %c0_i32_21 : i32
    scf.if %27 {
      %c0_45 = arith.constant 0 : index
      %c0_46 = arith.constant 0 : index
      %74 = vector.load %arg11[%c0_45, %c0_46] : memref<8x128xf32, #tpu.memory_space<vmem>>, vector<8x128xf32>
      %c0_47 = arith.constant 0 : index
      %c0_48 = arith.constant 0 : index
      %75 = vector.load %arg12[%c0_47, %c0_48] : memref<8x128xf32, #tpu.memory_space<vmem>>, vector<8x128xf32>
      %c0_49 = arith.constant 0 : index
      %c384 = arith.constant 384 : index
      %76 = vector.load %arg13[%c0_49, %c384] : memref<32x768xf32, #tpu.memory_space<vmem>>, vector<32x128xf32>
      %77 = arith.truncf %74 : vector<8x128xf32> to vector<8x128xbf16>
      %cst_50 = arith.constant dense<0.000000e+00> : vector<32x128xf32>
      %78 = tpu.matmul %15, %77, %cst_50 {dimension_numbers = #tpu.dot_dimension_numbers<[1], [0], [0], [1], [0, 0, 1, 1], [], []>} : vector<32x8xbf16>, vector<8x128xbf16>, vector<32x128xf32> -> vector<32x128xf32>
      %79 = arith.addf %76, %78 : vector<32x128xf32>
      %80 = vector.extract_strided_slice %79 {offsets = [0, 0], sizes = [8, 128], strides = [1, 1]} : vector<32x128xf32> to vector<8x128xf32>
      %cst_51 = arith.constant 5.000000e-01 : f32
      %81 = vector.broadcast %cst_51 : f32 to vector<8x128xf32>
      %82 = arith.mulf %81, %80 : vector<8x128xf32>
      %83 = math.tanh %82 : vector<8x128xf32>
      %cst_52 = arith.constant 5.000000e-01 : f32
      %84 = vector.broadcast %cst_52 : f32 to vector<8x128xf32>
      %85 = arith.mulf %84, %83 : vector<8x128xf32>
      %cst_53 = arith.constant 5.000000e-01 : f32
      %86 = vector.broadcast %cst_53 : f32 to vector<8x128xf32>
      %87 = arith.addf %85, %86 : vector<8x128xf32>
      %88 = vector.extract_strided_slice %79 {offsets = [8, 0], sizes = [8, 128], strides = [1, 1]} : vector<32x128xf32> to vector<8x128xf32>
      %cst_54 = arith.constant 5.000000e-01 : f32
      %89 = vector.broadcast %cst_54 : f32 to vector<8x128xf32>
      %90 = arith.mulf %89, %88 : vector<8x128xf32>
      %91 = math.tanh %90 : vector<8x128xf32>
      %cst_55 = arith.constant 5.000000e-01 : f32
      %92 = vector.broadcast %cst_55 : f32 to vector<8x128xf32>
      %93 = arith.mulf %92, %91 : vector<8x128xf32>
      %cst_56 = arith.constant 5.000000e-01 : f32
      %94 = vector.broadcast %cst_56 : f32 to vector<8x128xf32>
      %95 = arith.addf %93, %94 : vector<8x128xf32>
      %96 = vector.extract_strided_slice %79 {offsets = [16, 0], sizes = [8, 128], strides = [1, 1]} : vector<32x128xf32> to vector<8x128xf32>
      %97 = math.tanh %96 : vector<8x128xf32>
      %98 = vector.extract_strided_slice %79 {offsets = [24, 0], sizes = [8, 128], strides = [1, 1]} : vector<32x128xf32> to vector<8x128xf32>
      %cst_57 = arith.constant 5.000000e-01 : f32
      %99 = vector.broadcast %cst_57 : f32 to vector<8x128xf32>
      %100 = arith.mulf %99, %98 : vector<8x128xf32>
      %101 = math.tanh %100 : vector<8x128xf32>
      %cst_58 = arith.constant 5.000000e-01 : f32
      %102 = vector.broadcast %cst_58 : f32 to vector<8x128xf32>
      %103 = arith.mulf %102, %101 : vector<8x128xf32>
      %cst_59 = arith.constant 5.000000e-01 : f32
      %104 = vector.broadcast %cst_59 : f32 to vector<8x128xf32>
      %105 = arith.addf %103, %104 : vector<8x128xf32>
      %106 = arith.mulf %95, %75 : vector<8x128xf32>
      %107 = arith.mulf %87, %97 : vector<8x128xf32>
      %108 = arith.addf %106, %107 : vector<8x128xf32>
      %109 = math.tanh %108 : vector<8x128xf32>
      %110 = arith.mulf %105, %109 : vector<8x128xf32>
      %c3_i32_60 = arith.constant 3 : i32
      %111 = vector.broadcast %c3_i32_60 : i32 to vector<1x128xi32>
      %112 = arith.cmpi sgt, %14, %111 : vector<1x128xi32>
      %113 = vector.shape_cast %112 : vector<1x128xi1> to vector<1x128xi1>
      %114 = vector.broadcast %113 : vector<1x128xi1> to vector<8x128xi1>
      %115 = arith.select %114, %110, %74 : vector<8x128xi1>, vector<8x128xf32>
      %c0_61 = arith.constant 0 : index
      %c0_62 = arith.constant 0 : index
      %116 = vector.load %arg11[%c0_61, %c0_62] : memref<8x128xf32, #tpu.memory_space<vmem>>, vector<8x128xf32>
      tpu.vector_store %arg11[%c0_61, %c0_62], %115 {strides = array<i32>} : memref<8x128xf32, #tpu.memory_space<vmem>>, vector<8x128xf32>,
      %117 = vector.shape_cast %112 : vector<1x128xi1> to vector<1x128xi1>
      %118 = vector.broadcast %117 : vector<1x128xi1> to vector<8x128xi1>
      %119 = arith.select %118, %108, %75 : vector<8x128xi1>, vector<8x128xf32>
      %c0_63 = arith.constant 0 : index
      %c0_64 = arith.constant 0 : index
      %120 = vector.load %arg12[%c0_63, %c0_64] : memref<8x128xf32, #tpu.memory_space<vmem>>, vector<8x128xf32>
      tpu.vector_store %arg12[%c0_63, %c0_64], %119 {strides = array<i32>} : memref<8x128xf32, #tpu.memory_space<vmem>>, vector<8x128xf32>,
    } else {
    }
    %c4_i32 = arith.constant 4 : i32
    %28 = arith.cmpi sgt, %1, %c4_i32 : i32
    %29 = arith.extui %28 : i1 to i32
    %c0_i32_22 = arith.constant 0 : i32
    %30 = arith.cmpi ne, %29, %c0_i32_22 : i32
    scf.if %30 {
      %c0_45 = arith.constant 0 : index
      %c0_46 = arith.constant 0 : index
      %74 = vector.load %arg11[%c0_45, %c0_46] : memref<8x128xf32, #tpu.memory_space<vmem>>, vector<8x128xf32>
      %c0_47 = arith.constant 0 : index
      %c0_48 = arith.constant 0 : index
      %75 = vector.load %arg12[%c0_47, %c0_48] : memref<8x128xf32, #tpu.memory_space<vmem>>, vector<8x128xf32>
      %c0_49 = arith.constant 0 : index
      %c512 = arith.constant 512 : index
      %76 = vector.load %arg13[%c0_49, %c512] : memref<32x768xf32, #tpu.memory_space<vmem>>, vector<32x128xf32>
      %77 = arith.truncf %74 : vector<8x128xf32> to vector<8x128xbf16>
      %cst_50 = arith.constant dense<0.000000e+00> : vector<32x128xf32>
      %78 = tpu.matmul %15, %77, %cst_50 {dimension_numbers = #tpu.dot_dimension_numbers<[1], [0], [0], [1], [0, 0, 1, 1], [], []>} : vector<32x8xbf16>, vector<8x128xbf16>, vector<32x128xf32> -> vector<32x128xf32>
      %79 = arith.addf %76, %78 : vector<32x128xf32>
      %80 = vector.extract_strided_slice %79 {offsets = [0, 0], sizes = [8, 128], strides = [1, 1]} : vector<32x128xf32> to vector<8x128xf32>
      %cst_51 = arith.constant 5.000000e-01 : f32
      %81 = vector.broadcast %cst_51 : f32 to vector<8x128xf32>
      %82 = arith.mulf %81, %80 : vector<8x128xf32>
      %83 = math.tanh %82 : vector<8x128xf32>
      %cst_52 = arith.constant 5.000000e-01 : f32
      %84 = vector.broadcast %cst_52 : f32 to vector<8x128xf32>
      %85 = arith.mulf %84, %83 : vector<8x128xf32>
      %cst_53 = arith.constant 5.000000e-01 : f32
      %86 = vector.broadcast %cst_53 : f32 to vector<8x128xf32>
      %87 = arith.addf %85, %86 : vector<8x128xf32>
      %88 = vector.extract_strided_slice %79 {offsets = [8, 0], sizes = [8, 128], strides = [1, 1]} : vector<32x128xf32> to vector<8x128xf32>
      %cst_54 = arith.constant 5.000000e-01 : f32
      %89 = vector.broadcast %cst_54 : f32 to vector<8x128xf32>
      %90 = arith.mulf %89, %88 : vector<8x128xf32>
      %91 = math.tanh %90 : vector<8x128xf32>
      %cst_55 = arith.constant 5.000000e-01 : f32
      %92 = vector.broadcast %cst_55 : f32 to vector<8x128xf32>
      %93 = arith.mulf %92, %91 : vector<8x128xf32>
      %cst_56 = arith.constant 5.000000e-01 : f32
      %94 = vector.broadcast %cst_56 : f32 to vector<8x128xf32>
      %95 = arith.addf %93, %94 : vector<8x128xf32>
      %96 = vector.extract_strided_slice %79 {offsets = [16, 0], sizes = [8, 128], strides = [1, 1]} : vector<32x128xf32> to vector<8x128xf32>
      %97 = math.tanh %96 : vector<8x128xf32>
      %98 = vector.extract_strided_slice %79 {offsets = [24, 0], sizes = [8, 128], strides = [1, 1]} : vector<32x128xf32> to vector<8x128xf32>
      %cst_57 = arith.constant 5.000000e-01 : f32
      %99 = vector.broadcast %cst_57 : f32 to vector<8x128xf32>
      %100 = arith.mulf %99, %98 : vector<8x128xf32>
      %101 = math.tanh %100 : vector<8x128xf32>
      %cst_58 = arith.constant 5.000000e-01 : f32
      %102 = vector.broadcast %cst_58 : f32 to vector<8x128xf32>
      %103 = arith.mulf %102, %101 : vector<8x128xf32>
      %cst_59 = arith.constant 5.000000e-01 : f32
      %104 = vector.broadcast %cst_59 : f32 to vector<8x128xf32>
      %105 = arith.addf %103, %104 : vector<8x128xf32>
      %106 = arith.mulf %95, %75 : vector<8x128xf32>
      %107 = arith.mulf %87, %97 : vector<8x128xf32>
      %108 = arith.addf %106, %107 : vector<8x128xf32>
      %109 = math.tanh %108 : vector<8x128xf32>
      %110 = arith.mulf %105, %109 : vector<8x128xf32>
      %c4_i32_60 = arith.constant 4 : i32
      %111 = vector.broadcast %c4_i32_60 : i32 to vector<1x128xi32>
      %112 = arith.cmpi sgt, %14, %111 : vector<1x128xi32>
      %113 = vector.shape_cast %112 : vector<1x128xi1> to vector<1x128xi1>
      %114 = vector.broadcast %113 : vector<1x128xi1> to vector<8x128xi1>
      %115 = arith.select %114, %110, %74 : vector<8x128xi1>, vector<8x128xf32>
      %c0_61 = arith.constant 0 : index
      %c0_62 = arith.constant 0 : index
      %116 = vector.load %arg11[%c0_61, %c0_62] : memref<8x128xf32, #tpu.memory_space<vmem>>, vector<8x128xf32>
      tpu.vector_store %arg11[%c0_61, %c0_62], %115 {strides = array<i32>} : memref<8x128xf32, #tpu.memory_space<vmem>>, vector<8x128xf32>,
      %117 = vector.shape_cast %112 : vector<1x128xi1> to vector<1x128xi1>
      %118 = vector.broadcast %117 : vector<1x128xi1> to vector<8x128xi1>
      %119 = arith.select %118, %108, %75 : vector<8x128xi1>, vector<8x128xf32>
      %c0_63 = arith.constant 0 : index
      %c0_64 = arith.constant 0 : index
      %120 = vector.load %arg12[%c0_63, %c0_64] : memref<8x128xf32, #tpu.memory_space<vmem>>, vector<8x128xf32>
      tpu.vector_store %arg12[%c0_63, %c0_64], %119 {strides = array<i32>} : memref<8x128xf32, #tpu.memory_space<vmem>>, vector<8x128xf32>,
    } else {
    }
    %c5_i32 = arith.constant 5 : i32
    %31 = arith.cmpi sgt, %1, %c5_i32 : i32
    %32 = arith.extui %31 : i1 to i32
    %c0_i32_23 = arith.constant 0 : i32
    %33 = arith.cmpi ne, %32, %c0_i32_23 : i32
    scf.if %33 {
      %c0_45 = arith.constant 0 : index
      %c0_46 = arith.constant 0 : index
      %74 = vector.load %arg11[%c0_45, %c0_46] : memref<8x128xf32, #tpu.memory_space<vmem>>, vector<8x128xf32>
      %c0_47 = arith.constant 0 : index
      %c0_48 = arith.constant 0 : index
      %75 = vector.load %arg12[%c0_47, %c0_48] : memref<8x128xf32, #tpu.memory_space<vmem>>, vector<8x128xf32>
      %c0_49 = arith.constant 0 : index
      %c640 = arith.constant 640 : index
      %76 = vector.load %arg13[%c0_49, %c640] : memref<32x768xf32, #tpu.memory_space<vmem>>, vector<32x128xf32>
      %77 = arith.truncf %74 : vector<8x128xf32> to vector<8x128xbf16>
      %cst_50 = arith.constant dense<0.000000e+00> : vector<32x128xf32>
      %78 = tpu.matmul %15, %77, %cst_50 {dimension_numbers = #tpu.dot_dimension_numbers<[1], [0], [0], [1], [0, 0, 1, 1], [], []>} : vector<32x8xbf16>, vector<8x128xbf16>, vector<32x128xf32> -> vector<32x128xf32>
      %79 = arith.addf %76, %78 : vector<32x128xf32>
      %80 = vector.extract_strided_slice %79 {offsets = [0, 0], sizes = [8, 128], strides = [1, 1]} : vector<32x128xf32> to vector<8x128xf32>
      %cst_51 = arith.constant 5.000000e-01 : f32
      %81 = vector.broadcast %cst_51 : f32 to vector<8x128xf32>
      %82 = arith.mulf %81, %80 : vector<8x128xf32>
      %83 = math.tanh %82 : vector<8x128xf32>
      %cst_52 = arith.constant 5.000000e-01 : f32
      %84 = vector.broadcast %cst_52 : f32 to vector<8x128xf32>
      %85 = arith.mulf %84, %83 : vector<8x128xf32>
      %cst_53 = arith.constant 5.000000e-01 : f32
      %86 = vector.broadcast %cst_53 : f32 to vector<8x128xf32>
      %87 = arith.addf %85, %86 : vector<8x128xf32>
      %88 = vector.extract_strided_slice %79 {offsets = [8, 0], sizes = [8, 128], strides = [1, 1]} : vector<32x128xf32> to vector<8x128xf32>
      %cst_54 = arith.constant 5.000000e-01 : f32
      %89 = vector.broadcast %cst_54 : f32 to vector<8x128xf32>
      %90 = arith.mulf %89, %88 : vector<8x128xf32>
      %91 = math.tanh %90 : vector<8x128xf32>
      %cst_55 = arith.constant 5.000000e-01 : f32
      %92 = vector.broadcast %cst_55 : f32 to vector<8x128xf32>
      %93 = arith.mulf %92, %91 : vector<8x128xf32>
      %cst_56 = arith.constant 5.000000e-01 : f32
      %94 = vector.broadcast %cst_56 : f32 to vector<8x128xf32>
      %95 = arith.addf %93, %94 : vector<8x128xf32>
      %96 = vector.extract_strided_slice %79 {offsets = [16, 0], sizes = [8, 128], strides = [1, 1]} : vector<32x128xf32> to vector<8x128xf32>
      %97 = math.tanh %96 : vector<8x128xf32>
      %98 = vector.extract_strided_slice %79 {offsets = [24, 0], sizes = [8, 128], strides = [1, 1]} : vector<32x128xf32> to vector<8x128xf32>
      %cst_57 = arith.constant 5.000000e-01 : f32
      %99 = vector.broadcast %cst_57 : f32 to vector<8x128xf32>
      %100 = arith.mulf %99, %98 : vector<8x128xf32>
      %101 = math.tanh %100 : vector<8x128xf32>
      %cst_58 = arith.constant 5.000000e-01 : f32
      %102 = vector.broadcast %cst_58 : f32 to vector<8x128xf32>
      %103 = arith.mulf %102, %101 : vector<8x128xf32>
      %cst_59 = arith.constant 5.000000e-01 : f32
      %104 = vector.broadcast %cst_59 : f32 to vector<8x128xf32>
      %105 = arith.addf %103, %104 : vector<8x128xf32>
      %106 = arith.mulf %95, %75 : vector<8x128xf32>
      %107 = arith.mulf %87, %97 : vector<8x128xf32>
      %108 = arith.addf %106, %107 : vector<8x128xf32>
      %109 = math.tanh %108 : vector<8x128xf32>
      %110 = arith.mulf %105, %109 : vector<8x128xf32>
      %c5_i32_60 = arith.constant 5 : i32
      %111 = vector.broadcast %c5_i32_60 : i32 to vector<1x128xi32>
      %112 = arith.cmpi sgt, %14, %111 : vector<1x128xi32>
      %113 = vector.shape_cast %112 : vector<1x128xi1> to vector<1x128xi1>
      %114 = vector.broadcast %113 : vector<1x128xi1> to vector<8x128xi1>
      %115 = arith.select %114, %110, %74 : vector<8x128xi1>, vector<8x128xf32>
      %c0_61 = arith.constant 0 : index
      %c0_62 = arith.constant 0 : index
      %116 = vector.load %arg11[%c0_61, %c0_62] : memref<8x128xf32, #tpu.memory_space<vmem>>, vector<8x128xf32>
      tpu.vector_store %arg11[%c0_61, %c0_62], %115 {strides = array<i32>} : memref<8x128xf32, #tpu.memory_space<vmem>>, vector<8x128xf32>,
      %117 = vector.shape_cast %112 : vector<1x128xi1> to vector<1x128xi1>
      %118 = vector.broadcast %117 : vector<1x128xi1> to vector<8x128xi1>
      %119 = arith.select %118, %108, %75 : vector<8x128xi1>, vector<8x128xf32>
      %c0_63 = arith.constant 0 : index
      %c0_64 = arith.constant 0 : index
      %120 = vector.load %arg12[%c0_63, %c0_64] : memref<8x128xf32, #tpu.memory_space<vmem>>, vector<8x128xf32>
      tpu.vector_store %arg12[%c0_63, %c0_64], %119 {strides = array<i32>} : memref<8x128xf32, #tpu.memory_space<vmem>>, vector<8x128xf32>,
    } else {
    }
    %c0_i32_24 = arith.constant 0 : i32
    %34 = vector.broadcast %c0_i32_24 : i32 to vector<1x128xi32>
    %35 = arith.cmpi sgt, %14, %34 : vector<1x128xi32>
    %c0_25 = arith.constant 0 : index
    %c0_26 = arith.constant 0 : index
    %36 = vector.load %arg11[%c0_25, %c0_26] : memref<8x128xf32, #tpu.memory_space<vmem>>, vector<8x128xf32>
    %cst_27 = arith.constant 0.000000e+00 : f32
    %37 = vector.shape_cast %35 : vector<1x128xi1> to vector<1x128xi1>
    %38 = vector.broadcast %37 : vector<1x128xi1> to vector<8x128xi1>
    %39 = vector.broadcast %cst_27 : f32 to vector<8x128xf32>
    %40 = arith.select %38, %36, %39 : vector<8x128xi1>, vector<8x128xf32>
    %c0_28 = arith.constant 0 : index
    %c0_29 = arith.constant 0 : index
    %41 = vector.load %arg10[%c0_28, %c0_29] : memref<16x128xf32, #tpu.memory_space<vmem>>, vector<8x128xf32>
    tpu.vector_store %arg10[%c0_28, %c0_29], %40 {strides = array<i32>} : memref<16x128xf32, #tpu.memory_space<vmem>>, vector<8x128xf32>,
    %c0_30 = arith.constant 0 : index
    %c0_31 = arith.constant 0 : index
    %42 = vector.load %arg8[%c0_30, %c0_31] : memref<24x8xbf16, #tpu.memory_space<vmem>>, vector<24x8xbf16>
    %c0_32 = arith.constant 0 : index
    %c0_33 = arith.constant 0 : index
    %43 = vector.load %arg3[%c0_32, %c0_33] : memref<8x128xbf16, #tpu.memory_space<vmem>>, vector<8x128xbf16>
    %cst_34 = arith.constant dense<0.000000e+00> : vector<24x128xf32>
    %44 = tpu.matmul %42, %43, %cst_34 {dimension_numbers = #tpu.dot_dimension_numbers<[1], [0], [0], [1], [0, 0, 1, 1], [], []>} : vector<24x8xbf16>, vector<8x128xbf16>, vector<24x128xf32> -> vector<24x128xf32>
    %c0_35 = arith.constant 0 : index
    %c0_36 = arith.constant 0 : index
    %45 = vector.load %arg9[%c0_35, %c0_36] : memref<24x1xf32, #tpu.memory_space<vmem>>, vector<24x1xf32>
    %46 = vector.broadcast %45 : vector<24x1xf32> to vector<24x128xf32>
    %47 = arith.addf %44, %46 : vector<24x128xf32>
    %48 = vector.extract_strided_slice %47 {offsets = [0, 0], sizes = [8, 128], strides = [1, 1]} : vector<24x128xf32> to vector<8x128xf32>
    %cst_37 = arith.constant 5.000000e-01 : f32
    %49 = vector.broadcast %cst_37 : f32 to vector<8x128xf32>
    %50 = arith.mulf %49, %48 : vector<8x128xf32>
    %51 = math.tanh %50 : vector<8x128xf32>
    %cst_38 = arith.constant 5.000000e-01 : f32
    %52 = vector.broadcast %cst_38 : f32 to vector<8x128xf32>
    %53 = arith.mulf %52, %51 : vector<8x128xf32>
    %cst_39 = arith.constant 5.000000e-01 : f32
    %54 = vector.broadcast %cst_39 : f32 to vector<8x128xf32>
    %55 = arith.addf %53, %54 : vector<8x128xf32>
    %56 = vector.extract_strided_slice %47 {offsets = [8, 0], sizes = [8, 128], strides = [1, 1]} : vector<24x128xf32> to vector<8x128xf32>
    %57 = math.tanh %56 : vector<8x128xf32>
    %58 = vector.extract_strided_slice %47 {offsets = [16, 0], sizes = [8, 128], strides = [1, 1]} : vector<24x128xf32> to vector<8x128xf32>
    %cst_40 = arith.constant 5.000000e-01 : f32
    %59 = vector.broadcast %cst_40 : f32 to vector<8x128xf32>
    %60 = arith.mulf %59, %58 : vector<8x128xf32>
    %61 = math.tanh %60 : vector<8x128xf32>
    %cst_41 = arith.constant 5.000000e-01 : f32
    %62 = vector.broadcast %cst_41 : f32 to vector<8x128xf32>
    %63 = arith.mulf %62, %61 : vector<8x128xf32>
    %cst_42 = arith.constant 5.000000e-01 : f32
    %64 = vector.broadcast %cst_42 : f32 to vector<8x128xf32>
    %65 = arith.addf %63, %64 : vector<8x128xf32>
    %66 = arith.mulf %55, %57 : vector<8x128xf32>
    %67 = math.tanh %66 : vector<8x128xf32>
    %68 = arith.mulf %65, %67 : vector<8x128xf32>
    %cst_43 = arith.constant 0.000000e+00 : f32
    %69 = vector.shape_cast %35 : vector<1x128xi1> to vector<1x128xi1>
    %70 = vector.broadcast %69 : vector<1x128xi1> to vector<8x128xi1>
    %71 = vector.broadcast %cst_43 : f32 to vector<8x128xf32>
    %72 = arith.select %70, %68, %71 : vector<8x128xi1>, vector<8x128xf32>
    %c8 = arith.constant 8 : index
    %c0_44 = arith.constant 0 : index
    %73 = vector.load %arg10[%c8, %c0_44] : memref<16x128xf32, #tpu.memory_space<vmem>>, vector<8x128xf32>
    tpu.vector_store %arg10[%c8, %c0_44], %72 {strides = array<i32>} : memref<16x128xf32, #tpu.memory_space<vmem>>, vector<8x128xf32>,
    return
  }
  func.func @transform_0(%arg0: i32, %arg1: memref<1xi32, #tpu.memory_space<smem>>) -> (i32, i32, i32) {
    %c0_i32 = arith.constant 0 : i32
    %c0_i32_0 = arith.constant 0 : i32
    %c0_i32_1 = arith.constant 0 : i32
    return %arg0, %c0_i32, %c0_i32_0 : i32, i32, i32
  }
  func.func @transform_1(%arg0: i32, %arg1: memref<1xi32, #tpu.memory_space<smem>>) -> (i32, i32) {
    %c0_i32 = arith.constant 0 : i32
    %c0_i32_0 = arith.constant 0 : i32
    return %c0_i32, %arg0 : i32, i32
  }
  func.func @transform_2(%arg0: i32, %arg1: memref<1xi32, #tpu.memory_space<smem>>) -> (i32, i32) {
    %c0_i32 = arith.constant 0 : i32
    %c0_i32_0 = arith.constant 0 : i32
    return %c0_i32, %arg0 : i32, i32
  }
  func.func @transform_3(%arg0: i32, %arg1: memref<1xi32, #tpu.memory_space<smem>>) -> (i32, i32) {
    %c0_i32 = arith.constant 0 : i32
    %c0_i32_0 = arith.constant 0 : i32
    %c0_i32_1 = arith.constant 0 : i32
    return %c0_i32, %c0_i32_0 : i32, i32
  }
  func.func @transform_4(%arg0: i32, %arg1: memref<1xi32, #tpu.memory_space<smem>>) -> (i32, i32) {
    %c0_i32 = arith.constant 0 : i32
    %c0_i32_0 = arith.constant 0 : i32
    %c0_i32_1 = arith.constant 0 : i32
    return %c0_i32, %c0_i32_0 : i32, i32
  }
  func.func @transform_5(%arg0: i32, %arg1: memref<1xi32, #tpu.memory_space<smem>>) -> (i32, i32) {
    %c0_i32 = arith.constant 0 : i32
    %c0_i32_0 = arith.constant 0 : i32
    %c0_i32_1 = arith.constant 0 : i32
    return %c0_i32, %c0_i32_0 : i32, i32
  }
  func.func @transform_6(%arg0: i32, %arg1: memref<1xi32, #tpu.memory_space<smem>>) -> (i32, i32) {
    %c0_i32 = arith.constant 0 : i32
    %c0_i32_0 = arith.constant 0 : i32
    %c0_i32_1 = arith.constant 0 : i32
    return %c0_i32, %c0_i32_0 : i32, i32
  }
  func.func @transform_7(%arg0: i32, %arg1: memref<1xi32, #tpu.memory_space<smem>>) -> (i32, i32) {
    %c0_i32 = arith.constant 0 : i32
    %c0_i32_0 = arith.constant 0 : i32
    %c0_i32_1 = arith.constant 0 : i32
    return %c0_i32, %c0_i32_0 : i32, i32
  }
  func.func @transform_8(%arg0: i32, %arg1: memref<1xi32, #tpu.memory_space<smem>>) -> (i32, i32) {
    %c0_i32 = arith.constant 0 : i32
    %c0_i32_0 = arith.constant 0 : i32
    return %c0_i32, %arg0 : i32, i32
  }
}

</mosaic_0001>

<bundles_post_ra>
// kernel: tpu_custom_call.1
= control target key start
LH: loop header
LB: loop body
LE: loop exit
PB: predicated region body
PF: predicated region fallthrough
CT: control target
= control target key end

     0   :  { %15 = vsyncpa [#allocation8], 0  ;;  %vm97_vm0 = vcmask 1043456   ;;  %v1345_v3 = vmov 0   ;;  %vm90_vm1 = vcmask 64512   ;;  %v1346_v19 = vmov 0.0   ;;  %s1599_s0 = inlined_call_operand.<no memory space> [shape: s32[1], index: 0, kind: input, shape index: {}]   ;;  %s1600_s1 = inlined_call_operand.vmem [shape: bf16[1,8,768], index: 1, kind: input, shape index: {}]   ;;  %s1601_s2 = inlined_call_operand.vmem [shape: bf16[8,128], index: 2, kind: input, shape index: {}]   ;;  %s1602_s3 = inlined_call_operand.vmem [shape: s32[1,128], index: 3, kind: input, shape index: {}]   ;;  %s1603_s4 = inlined_call_operand.vmem [shape: bf16[32,8], index: 4, kind: input, shape index: {}]   ;;  %s1604_s5 = inlined_call_operand.vmem [shape: bf16[32,8], index: 5, kind: input, shape index: {}]   ;;  %s1605_s6 = inlined_call_operand.vmem [shape: f32[32,1], index: 6, kind: input, shape index: {}]   ;;  %s1606_s7 = inlined_call_operand.vmem [shape: bf16[24,8], index: 7, kind: input, shape index: {}]   ;;  %s1607_s8 = inlined_call_operand.vmem [shape: f32[24,1], index: 8, kind: input, shape index: {}]   ;;  %s1608_s9 = inlined_call_operand.hbm [shape: f32[16,128], index: 9, kind: output, shape index: {}]  }
   0x1   :  { %v38_v0 = vld [vmem:[%s1600_s1] sm:$0xff]  ;;  %148 = vmatprep.mubr.bf16.mxu0 %v1345_v3  ;;  %158 = vmatprep.mubr.bf16.mxu1 %v1345_v3  ;;  %v1244_v5 = vld [vmem:[%s1603_s4 + $0x8] sm:$0xff]   ;;  %v40_v9 = vld [vmem:[%s1600_s1 + $0x10] sm:$0xff]  ;;  %299 = vst [vmem:[#allocation2] sm:$0xff] %v1346_v19  ;;  %p1122_p0 = scmp.le.s32.totalorder %s1599_s0, 0 }
   0x2   :  { %v1108_v1 = vcombine.high %v38_v0, %v38_v0  ;;  %v1107_v2 = vcombine.low %v38_v0, %v38_v0  ;;  %v1243_v4 = vld [vmem:[%s1603_s4] sm:$0xff]   ;;  %v39_v6 = vld [vmem:[%s1600_s1 + $0x8] sm:$0xff]  ;;  %1240 = vset.pattern.permute.xlu1 %v1345_v3  ;;  %1239 = vset.pattern.permute.xlu0 %v1345_v3  ;;  %v43_v11 = vld [vmem:[%s1605_s6 + $0x10] sm:$0xff]  ;;  %v1112_v13 = vcombine.high %v40_v9, %v40_v9 }
   0x3   :  { %v1110_v8 = vcombine.high %v39_v6, %v39_v6  ;;  %v1109_v10 = vcombine.low %v39_v6, %v39_v6  ;;  %v41_v12 = vld [vmem:[%s1605_s6] sm:$0xff]  ;;  %v1111_v14 = vcombine.low %v40_v9, %v40_v9  ;;  %57 = vperm.xlu1 %1240, %v43_v11   ;;  %v44_v17 = vld [vmem:[%s1605_s6 + $0x18] sm:$0xff]  ;;  %v42_v18 = vld [vmem:[%s1605_s6 + $0x8] sm:$0xff]  ;;  %300 = vst [vmem:[#allocation3] sm:$0xff] %v1346_v19 }
   0x4   :  { %1113 = vmatprep.subr.msk.bf16.mxu0 %vm97_vm0, %v1108_v1  ;;  %1219 = vmatprep.subr.msk.bf16.mxu1 %vm97_vm0, %v1108_v1  ;;  %v99_v7 = vsel %vm97_vm0, %v1107_v2, 0  ;;  %v1457_v20 = vld [vmem:[%s1602_s3] sm:$0x1]  ;;  %v1467_v22 = vld [vmem:[%s1604_s5 + $0x4] sm:$0xf] }
   0x5   :  { %117 = vmatpush1.bf16.msra.mxu0 %v99_v7  ;;  %1220 = vmatpush1.bf16.msra.mxu1 %v99_v7  ;;  %v105_v15 = vsel %vm97_vm0, %v1109_v10, 0  ;;  %v111_v16 = vsel %vm97_vm0, %v1111_v14, 0  ;;  %v1462_v21 = vld [vmem:[%s1604_s5] sm:$0xf]  ;;  %v1472_v23 = vld [vmem:[%s1604_s5 + $0x8] sm:$0xf] }
   0x6   :  { %1116 = vmatprep.subr.msk.bf16.mxu1 %vm97_vm0, %v1110_v8  ;;  %1119 = vmatprep.subr.msk.bf16.mxu0 %vm97_vm0, %v1112_v13  ;;  %v1477_v24 = vld [vmem:[%s1604_s5 + $0xc] sm:$0xf]  ;;  %vm407_vm2 = vcmp.gt.s32.totalorder (!%p1122_p0), %v1457_v20, 0 }
   0x7   :  { %47 = vperm.xlu0 %1239, %v41_v12   ;;  %62 = vperm.xlu1 %1240, %v44_v17  }
   0x8   :  { %1114 = vmatmul.mubr.msk.bf16.vlgmr.msra.gmra.mrb[0].mxu0 %vm90_vm1, %v1243_v4  ;;  %1115 = vmatmul.mubr.msk.bf16.vlgmr.msra.gmra.mrb[0].mxu1 %vm90_vm1, %v1244_v5  ;;  %v310_v14 = vld [vmem:[#allocation2] sm:$0xff] (!%p1122_p0) }
   0x9   :  { %170 = vmatpush1.bf16.msra.mxu1 %v105_v15  ;;  %223 = vmatpush1.bf16.msra.mxu0 %v111_v16  ;;  %v1123_v15 = vcombine.low (!%p1122_p0), %v1462_v21, %v1467_v22  ;;  %v316_v16 = vpack.c.bf16 (!%p1122_p0), %v310_v14, %v310_v14 }
   0xa   :  { %201 = vmatprep.mubr.bf16.mxu1 %v1345_v3  ;;  %254 = vmatprep.mubr.bf16.mxu0 %v1345_v3 }
   0xb   :  { %52 = vperm.xlu0 %1239, %v42_v18   ;;  %1221 = vmatprep.subr.msk.bf16.mxu0 (!%p1122_p0), %vm97_vm0, %v316_v16  ;;  %v334_v17 = vsel (!%p1122_p0), %vm97_vm0, %v316_v16, 0  ;;  %v1124_v18 = vcombine.low (!%p1122_p0), %v1472_v23, %v1477_v24 }
  0x10   :  { %1117 = vmatmul.mubr.msk.bf16.vlgmr.msra.gmra.mrb[4].mxu1 %vm90_vm1, %v1243_v4  ;;  %1120 = vmatmul.mubr.msk.bf16.vlgmr.msra.gmra.mrb[4].mxu0 %vm90_vm1, %v1243_v4 }
  0x11   :  { %211 = vmatprep.mubr.bf16.mxu1 %v1345_v3  ;;  %264 = vmatprep.mubr.bf16.mxu0 %v1345_v3 }
  0x12   :  { %1178 = vmatpush3.bf16.msra.mxu0 (!%p1122_p0), %v334_v17 }
  0x18   :  { %1118 = vmatmul.mubr.msk.bf16.gmra.mrb[8].mxu1 %vm90_vm1, %v1244_v5  ;;  %1121 = vmatmul.mubr.msk.bf16.gmra.mrb[8].mxu0 %vm90_vm1, %v1244_v5 }
  0x19   :  { %1179 = vmatprep.mubr.msk.bf16.mxu0 (!%p1122_p0), %vm90_vm1, %v1123_v15 }
  0x82   :  { %v58_v25 = vpop.permute.xlu1 %57 }
  0x86   :  { %v48_v26 = vpop.permute.xlu0 %47  ;;  %v1479_v27 = vpop.permute.xlu1 %62 }
  0x8a   :  { %v53_v28 = vpop.permute.xlu0 %52 }
  0xdb   :  { %v150_v29 = vpop.f32.mrb[0].mxu0  ;;  %v160_v30 = vpop.f32.mrb[0].mxu1 }
  0xdc   :  { %v151_v31 = vadd.f32 %v150_v29, %v48_v26  ;;  %v161_v32 = vadd.f32 %v160_v30, %v58_v25  ;;  %v152_v33 = vpop.f32.mrb[1].mxu0  ;;  %v162_v34 = vpop.f32.mrb[1].mxu1 }
  0xdd   :  { %v153_v35 = vadd.f32 %v152_v33, %v48_v26  ;;  %v163_v36 = vadd.f32 %v162_v34, %v58_v25  ;;  %v154_v37 = vpop.f32.mrb[2].mxu0  ;;  %v164_v38 = vpop.f32.mrb[2].mxu1 }
  0xde   :  { %275 = vst [vmem:[#allocation4] sm:$0xff] %v151_v31  ;;  %287 = vst [vmem:[#allocation4 + $0x60] sm:$0xff] %v161_v32  ;;  %v155_v39 = vadd.f32 %v154_v37, %v53_v28  ;;  %v165_v40 = vadd.f32 %v164_v38, %v1479_v27  ;;  %v156_v41 = vpop.f32.mrb[3].mxu0  ;;  %v166_v42 = vpop.f32.mrb[3].mxu1  ;;  %1180 = vmatmul.mubr.msk.bf16.vlgmr.msra.gmra.mrb[0].mxu0 (!%p1122_p0), %vm90_vm1, %v1124_v18  ;;  %v409_v37 = vlaneseq (!%p1122_p0) }
  0xdf   :  { %276 = vst [vmem:[#allocation4 + $0x8] sm:$0xff] %v153_v35  ;;  %288 = vst [vmem:[#allocation4 + $0x68] sm:$0xff] %v163_v36  ;;  %v157_v43 = vadd.f32 %v156_v41, %v53_v28  ;;  %v167_v44 = vadd.f32 %v166_v42, %v1479_v27 }
  0xe0   :  { %281 = vst [vmem:[#allocation4 + $0x30] sm:$0xff] %v155_v39  ;;  %293 = vst [vmem:[#allocation4 + $0x90] sm:$0xff] %v165_v40  ;;  %v410_v39 = vshrl.u32 (!%p1122_p0), %v409_v37, 7 }
  0xe1   :  { %282 = vst [vmem:[#allocation4 + $0x38] sm:$0xff] %v157_v43  ;;  %294 = vst [vmem:[#allocation4 + $0x98] sm:$0xff] %v167_v44  ;;  %v1347_v44 = vmov (!%p1122_p0), 0  }
  0xe2   :  { %v411_v42 = vsub.s32 (!%p1122_p0), 0, %v410_v39 }
  0xe3   :  { %v203_v45 = vpop.f32.mrb[4].mxu1  ;;  %v256_v46 = vpop.f32.mrb[4].mxu0 }
  0xe4   :  { %v204_v47 = vadd.f32 %v203_v45, %v48_v26  ;;  %v257_v48 = vadd.f32 %v256_v46, %v48_v26  ;;  %v205_v49 = vpop.f32.mrb[5].mxu1  ;;  %v258_v50 = vpop.f32.mrb[5].mxu0  ;;  %v408_v45 = vsel (!%p1122_p0), %vm407_vm2, 1, %v1347_v44 }
  0xe5   :  { %v206_v51 = vadd.f32 %v205_v49, %v48_v26  ;;  %v259_v52 = vadd.f32 %v258_v50, %v48_v26  ;;  %v207_v53 = vpop.f32.mrb[6].mxu1  ;;  %v260_v54 = vpop.f32.mrb[6].mxu0  ;;  %v312_v19 = vld [vmem:[#allocation4] sm:$0xff] (!%p1122_p0)  ;;  %v311_v50 = vld [vmem:[#allocation3] sm:$0xff] (!%p1122_p0) }
  0xe6   :  { %277 = vst [vmem:[#allocation4 + $0x10] sm:$0xff] %v204_v47  ;;  %279 = vst [vmem:[#allocation4 + $0x20] sm:$0xff] %v257_v48  ;;  %v208_v55 = vadd.f32 %v207_v53, %v53_v28  ;;  %v261_v56 = vadd.f32 %v260_v54, %v53_v28  ;;  %v209_v57 = vpop.f32.mrb[7].mxu1  ;;  %v262_v58 = vpop.f32.mrb[7].mxu0  ;;  %v314_v30 = vld [vmem:[#allocation4 + $0x60] sm:$0xff] (!%p1122_p0) }
  0xe7   :  { %278 = vst [vmem:[#allocation4 + $0x18] sm:$0xff] %v206_v51  ;;  %280 = vst [vmem:[#allocation4 + $0x28] sm:$0xff] %v259_v52  ;;  %v210_v59 = vadd.f32 %v209_v57, %v53_v28  ;;  %v263_v60 = vadd.f32 %v262_v58, %v53_v28  ;;  %v315_v36 = vld [vmem:[#allocation4 + $0x90] sm:$0xff] (!%p1122_p0)  ;;  %v412_v51 = vrot.slane (!%p1122_p0), %v408_v45, %v411_v42 }
  0xe8   :  { %283 = vst [vmem:[#allocation4 + $0x40] sm:$0xff] %v208_v55  ;;  %285 = vst [vmem:[#allocation4 + $0x50] sm:$0xff] %v261_v56 }
  0xe9   :  { %284 = vst [vmem:[#allocation4 + $0x48] sm:$0xff] %v210_v59  ;;  %286 = vst [vmem:[#allocation4 + $0x58] sm:$0xff] %v263_v60  ;;  %vm413_vm3 = vcmp.eq.s32.totalorder (!%p1122_p0), %v412_v51, 1 }
  0xeb   :  { %v213_v61 = vpop.f32.mrb[8].mxu1  ;;  %v266_v62 = vpop.f32.mrb[8].mxu0  ;;  %309 = sbr.rel (%p1122_p0) target bundleno = 475 (0x1db), region = 37 }
  0xec   :  { %v214_v63 = vadd.f32 %v213_v61, %v58_v25  ;;  %v267_v0 = vadd.f32 %v266_v62, %v58_v25  ;;  %v215_v1 = vpop.f32.mrb[9].mxu1  ;;  %v268_v2 = vpop.f32.mrb[9].mxu0 }
  0xed   :  { %v216_v4 = vadd.f32 %v215_v1, %v58_v25  ;;  %v269_v5 = vadd.f32 %v268_v2, %v58_v25  ;;  %v217_v6 = vpop.f32.mrb[10].mxu1  ;;  %v270_v7 = vpop.f32.mrb[10].mxu0 }
  0xee   :  { %289 = vst [vmem:[#allocation4 + $0x70] sm:$0xff] %v214_v63  ;;  %291 = vst [vmem:[#allocation4 + $0x80] sm:$0xff] %v267_v0  ;;  %v218_v8 = vadd.f32 %v217_v6, %v1479_v27  ;;  %v271_v9 = vadd.f32 %v270_v7, %v1479_v27  ;;  %v219_v10 = vpop.f32.mrb[11].mxu1  ;;  %v272_v11 = vpop.f32.mrb[11].mxu0 }
  0xef   :  { %290 = vst [vmem:[#allocation4 + $0x78] sm:$0xff] %v216_v4  ;;  %292 = vst [vmem:[#allocation4 + $0x88] sm:$0xff] %v269_v5  ;;  %v220_v12 = vadd.f32 %v219_v10, %v1479_v27  ;;  %v273_v13 = vadd.f32 %v272_v11, %v1479_v27  ;;  %v313_v27 = vld [vmem:[#allocation4 + $0x30] sm:$0xff] (!%p1122_p0) }
  0xf0   :  { %295 = vst [vmem:[#allocation4 + $0xa0] sm:$0xff] %v218_v8  ;;  %297 = vst [vmem:[#allocation4 + $0xb0] sm:$0xff] %v271_v9 }
  0xf1   :  { %296 = vst [vmem:[#allocation4 + $0xa8] sm:$0xff] %v220_v12  ;;  %298 = vst [vmem:[#allocation4 + $0xb8] sm:$0xff] %v273_v13 }
 0x1b1   :  { %v1181_v25 = vpop.f32.mrb[0].mxu0 }
 0x1b2   :  { %v370_v26 = vpop.f32.mrb[1].mxu0  ;;  %v387_v34 = vadd.f32 %v1181_v25, %v314_v30 }
 0x1b3   :  { %v385_v28 = vadd.f32 %v370_v26, %v312_v19  ;;  %v1182_v29 = vpop.f32.mrb[2].mxu0 }
 0x1b4   :  { %v373_v31 = vpop.f32.mrb[3].mxu0  ;;  %v388_v38 = vadd.f32 %v1182_v29, %v315_v36 }
 0x1b5   :  { %v389_v32 = vmul.f32 0.5, %v385_v28  ;;  %v386_v33 = vadd.f32 %v373_v31, %v313_v27 }
 0x1b6   :  { %v398_v40 = vmul.f32 0.5, %v388_v38 }
 0x1b7   :  { %1249 = vtanh.f32 %v389_v32  ;;  %v393_v35 = vmul.f32 0.5, %v386_v33 }
 0x1b9   :  { %1251 = vtanh.f32 %v393_v35 }
 0x1ba   :  { %1253 = vtanh.f32 %v387_v34 }
 0x1bb   :  { %1255 = vtanh.f32 %v398_v40 }
 0x1c1   :  { %v1250_v41 = vpop.eup %1249 }
 0x1c2   :  { %v391_v43 = vmul.f32 0.5, %v1250_v41 }
 0x1c3   :  { %v1252_v46 = vpop.eup %1251 }
 0x1c4   :  { %v392_v47 = vadd.f32 0.5, %v391_v43  ;;  %v395_v48 = vmul.f32 0.5, %v1252_v46  ;;  %v1254_v49 = vpop.eup %1253 }
 0x1c5   :  { %v1256_v57 = vpop.eup %1255 }
 0x1c6   :  { %v403_v52 = vmul.f32 %v1254_v49, %v392_v47  ;;  %v396_v53 = vadd.f32 0.5, %v395_v48  ;;  %v400_v58 = vmul.f32 0.5, %v1256_v57 }
 0x1c8   :  { %v402_v54 = vmul.f32 %v396_v53, %v311_v50  ;;  %v401_v59 = vadd.f32 0.5, %v400_v58 }
 0x1ca   :  { %v404_v55 = vadd.f32 %v403_v52, %v402_v54 }
 0x1cc   :  { %1257 = vtanh.f32 %v404_v55  ;;  %v416_v56 = vsel %vm413_vm3, %v404_v55, %v311_v50 }
 0x1cd   :  { %417 = vst [vmem:[#allocation3] sm:$0xff] %v416_v56 }
 0x1d6   :  { %v1258_v60 = vpop.eup %1257 }
 0x1d7   :  { %v406_v61 = vmul.f32 %v1258_v60, %v401_v59 }
 0x1d9   :  { %v414_v62 = vsel %vm413_vm3, %v406_v61, %v310_v14 }
 0x1da   :  { %415 = vst [vmem:[#allocation2] sm:$0xff] %v414_v62 }
 0x1db PF:  { %p1127_p1 = scmp.le.s32.totalorder %s1599_s0, 1 }
 0x1dc   :  { %v1128_v0 = vcombine.low (!%p1127_p1), %v1462_v21, %v1467_v22  ;;  %v1129_v4 = vcombine.low (!%p1127_p1), %v1472_v23, %v1477_v24  ;;  %v424_v5 = vld [vmem:[#allocation4 + $0x8] sm:$0xff] (!%p1127_p1)  ;;  %v425_v8 = vld [vmem:[#allocation4 + $0x38] sm:$0xff] (!%p1127_p1)  ;;  %v521_v18 = vlaneseq (!%p1127_p1)  ;;  %vm519_vm4 = vcmp.gt.s32.totalorder (!%p1127_p1), %v1457_v20, 1 }
 0x1dd   :  { %421 = sbr.rel (%p1127_p1) target bundleno = 741 (0x2e5), region = 41  ;;  %v426_v11 = vld [vmem:[#allocation4 + $0x68] sm:$0xff] (!%p1127_p1)  ;;  %v427_v17 = vld [vmem:[#allocation4 + $0x98] sm:$0xff] (!%p1127_p1)  ;;  %v1348_v30 = vmov (!%p1127_p1), 0  }
 0x1de   :  { %1185 = vmatprep.mubr.msk.bf16.mxu0 (!%p1127_p1), %vm90_vm1, %v1128_v0  ;;  %v522_v25 = vshrl.u32 (!%p1127_p1), %v521_v18, 7  ;;  %v520_v31 = vsel (!%p1127_p1), %vm519_vm4, 1, %v1348_v30  ;;  %v423_v36 = vld [vmem:[#allocation3] sm:$0xff] (!%p1127_p1) }
 0x1e0   :  { %v523_v28 = vsub.s32 (!%p1127_p1), 0, %v522_v25 }
 0x1e1   :  { %v422_v63 = vld [vmem:[#allocation2] sm:$0xff] (!%p1127_p1) }
 0x1e2   :  { %v428_v1 = vpack.c.bf16 (!%p1127_p1), %v422_v63, %v422_v63  ;;  %v524_v37 = vrot.slane (!%p1127_p1), %v520_v31, %v523_v28 }
 0x1e4   :  { %1222 = vmatprep.subr.msk.bf16.mxu0 %vm97_vm0, %v428_v1  ;;  %v446_v2 = vsel %vm97_vm0, %v428_v1, 0  ;;  %vm525_vm5 = vcmp.eq.s32.totalorder %v524_v37, 1 }
 0x1e5   :  { %1184 = vmatpush3.bf16.msra.mxu0 %v446_v2 }
 0x1e8   :  { %1186 = vmatmul.mubr.msk.bf16.vlgmr.msra.gmra.mrb[0].mxu0 %vm90_vm1, %v1129_v4 }
 0x2bb   :  { %v1187_v6 = vpop.f32.mrb[0].mxu0 }
 0x2bc   :  { %v482_v7 = vpop.f32.mrb[1].mxu0  ;;  %v499_v15 = vadd.f32 %v1187_v6, %v426_v11 }
 0x2bd   :  { %v497_v9 = vadd.f32 %v482_v7, %v424_v5  ;;  %v1188_v10 = vpop.f32.mrb[2].mxu0 }
 0x2be   :  { %v485_v12 = vpop.f32.mrb[3].mxu0  ;;  %v500_v19 = vadd.f32 %v1188_v10, %v427_v17 }
 0x2bf   :  { %v501_v13 = vmul.f32 0.5, %v497_v9  ;;  %v498_v14 = vadd.f32 %v485_v12, %v425_v8 }
 0x2c0   :  { %v510_v26 = vmul.f32 0.5, %v500_v19 }
 0x2c1   :  { %1259 = vtanh.f32 %v501_v13  ;;  %v505_v16 = vmul.f32 0.5, %v498_v14 }
 0x2c3   :  { %1261 = vtanh.f32 %v505_v16 }
 0x2c4   :  { %1263 = vtanh.f32 %v499_v15 }
 0x2c5   :  { %1265 = vtanh.f32 %v510_v26 }
 0x2cb   :  { %v1260_v27 = vpop.eup %1259 }
 0x2cc   :  { %v503_v29 = vmul.f32 0.5, %v1260_v27 }
 0x2cd   :  { %v1262_v32 = vpop.eup %1261 }
 0x2ce   :  { %v504_v33 = vadd.f32 0.5, %v503_v29  ;;  %v507_v34 = vmul.f32 0.5, %v1262_v32  ;;  %v1264_v35 = vpop.eup %1263 }
 0x2cf   :  { %v1266_v43 = vpop.eup %1265 }
 0x2d0   :  { %v515_v38 = vmul.f32 %v1264_v35, %v504_v33  ;;  %v508_v39 = vadd.f32 0.5, %v507_v34  ;;  %v512_v44 = vmul.f32 0.5, %v1266_v43 }
 0x2d2   :  { %v514_v40 = vmul.f32 %v508_v39, %v423_v36  ;;  %v513_v45 = vadd.f32 0.5, %v512_v44 }
 0x2d4   :  { %v516_v41 = vadd.f32 %v515_v38, %v514_v40 }
 0x2d6   :  { %1267 = vtanh.f32 %v516_v41  ;;  %v528_v42 = vsel %vm525_vm5, %v516_v41, %v423_v36 }
 0x2d7   :  { %529 = vst [vmem:[#allocation3] sm:$0xff] %v528_v42 }
 0x2e0   :  { %v1268_v46 = vpop.eup %1267 }
 0x2e1   :  { %v518_v47 = vmul.f32 %v1268_v46, %v513_v45 }
 0x2e3   :  { %v526_v48 = vsel %vm525_vm5, %v518_v47, %v422_v63 }
 0x2e4   :  { %527 = vst [vmem:[#allocation2] sm:$0xff] %v526_v48 }
 0x2e5 PF:  { %p1132_p2 = scmp.le.s32.totalorder %s1599_s0, 2 }
 0x2e6   :  { %v1133_v50 = vcombine.low (!%p1132_p2), %v1462_v21, %v1467_v22  ;;  %v1134_v53 = vcombine.low (!%p1132_p2), %v1472_v23, %v1477_v24  ;;  %v536_v54 = vld [vmem:[#allocation4 + $0x10] sm:$0xff] (!%p1132_p2)  ;;  %v537_v57 = vld [vmem:[#allocation4 + $0x40] sm:$0xff] (!%p1132_p2)  ;;  %v633_v4 = vlaneseq (!%p1132_p2)  ;;  %vm631_vm6 = vcmp.gt.s32.totalorder (!%p1132_p2), %v1457_v20, 2  ;;  %v535_v17 = vld [vmem:[#allocation3] sm:$0xff] (!%p1132_p2) }
 0x2e7   :  { %533 = sbr.rel (%p1132_p2) target bundleno = 1007 (0x3ef), region = 45  ;;  %v538_v60 = vld [vmem:[#allocation4 + $0x70] sm:$0xff] (!%p1132_p2)  ;;  %v539_v2 = vld [vmem:[#allocation4 + $0xa0] sm:$0xff] (!%p1132_p2)  ;;  %v1349_v11 = vmov (!%p1132_p2), 0  }
 0x2e8   :  { %1191 = vmatprep.mubr.msk.bf16.mxu0 (!%p1132_p2), %vm90_vm1, %v1133_v50  ;;  %v634_v6 = vshrl.u32 (!%p1132_p2), %v633_v4, 7  ;;  %v632_v12 = vsel (!%p1132_p2), %vm631_vm6, 1, %v1349_v11 }
 0x2ea   :  { %v635_v9 = vsub.s32 (!%p1132_p2), 0, %v634_v6 }
 0x2eb   :  { %v534_v49 = vld [vmem:[#allocation2] sm:$0xff] (!%p1132_p2) }
 0x2ec   :  { %v540_v51 = vpack.c.bf16 (!%p1132_p2), %v534_v49, %v534_v49  ;;  %v636_v18 = vrot.slane (!%p1132_p2), %v632_v12, %v635_v9 }
 0x2ee   :  { %1223 = vmatprep.subr.msk.bf16.mxu0 %vm97_vm0, %v540_v51  ;;  %v558_v52 = vsel %vm97_vm0, %v540_v51, 0  ;;  %vm637_vm7 = vcmp.eq.s32.totalorder %v636_v18, 1 }
 0x2ef   :  { %1190 = vmatpush3.bf16.msra.mxu0 %v558_v52 }
 0x2f2   :  { %1192 = vmatmul.mubr.msk.bf16.vlgmr.msra.gmra.mrb[0].mxu0 %vm90_vm1, %v1134_v53 }
 0x3c5   :  { %v1193_v55 = vpop.f32.mrb[0].mxu0 }
 0x3c6   :  { %v594_v56 = vpop.f32.mrb[1].mxu0  ;;  %v611_v0 = vadd.f32 %v1193_v55, %v538_v60 }
 0x3c7   :  { %v609_v58 = vadd.f32 %v594_v56, %v536_v54  ;;  %v1194_v59 = vpop.f32.mrb[2].mxu0 }
 0x3c8   :  { %v597_v61 = vpop.f32.mrb[3].mxu0  ;;  %v612_v5 = vadd.f32 %v1194_v59, %v539_v2 }
 0x3c9   :  { %v613_v62 = vmul.f32 0.5, %v609_v58  ;;  %v610_v63 = vadd.f32 %v597_v61, %v537_v57 }
 0x3ca   :  { %v622_v7 = vmul.f32 0.5, %v612_v5 }
 0x3cb   :  { %1269 = vtanh.f32 %v613_v62  ;;  %v617_v1 = vmul.f32 0.5, %v610_v63 }
 0x3cd   :  { %1271 = vtanh.f32 %v617_v1 }
 0x3ce   :  { %1273 = vtanh.f32 %v611_v0 }
 0x3cf   :  { %1275 = vtanh.f32 %v622_v7 }
 0x3d5   :  { %v1270_v8 = vpop.eup %1269 }
 0x3d6   :  { %v615_v10 = vmul.f32 0.5, %v1270_v8 }
 0x3d7   :  { %v1272_v13 = vpop.eup %1271 }
 0x3d8   :  { %v616_v14 = vadd.f32 0.5, %v615_v10  ;;  %v619_v15 = vmul.f32 0.5, %v1272_v13  ;;  %v1274_v16 = vpop.eup %1273 }
 0x3d9   :  { %v1276_v29 = vpop.eup %1275 }
 0x3da   :  { %v627_v19 = vmul.f32 %v1274_v16, %v616_v14  ;;  %v620_v25 = vadd.f32 0.5, %v619_v15  ;;  %v624_v30 = vmul.f32 0.5, %v1276_v29 }
 0x3dc   :  { %v626_v26 = vmul.f32 %v620_v25, %v535_v17  ;;  %v625_v31 = vadd.f32 0.5, %v624_v30 }
 0x3de   :  { %v628_v27 = vadd.f32 %v627_v19, %v626_v26 }
 0x3e0   :  { %1277 = vtanh.f32 %v628_v27  ;;  %v640_v28 = vsel %vm637_vm7, %v628_v27, %v535_v17 }
 0x3e1   :  { %641 = vst [vmem:[#allocation3] sm:$0xff] %v640_v28 }
 0x3ea   :  { %v1278_v32 = vpop.eup %1277 }
 0x3eb   :  { %v630_v33 = vmul.f32 %v1278_v32, %v625_v31 }
 0x3ed   :  { %v638_v34 = vsel %vm637_vm7, %v630_v33, %v534_v49 }
 0x3ee   :  { %639 = vst [vmem:[#allocation2] sm:$0xff] %v638_v34 }
 0x3ef PF:  { %p1137_p3 = scmp.le.s32.totalorder %s1599_s0, 3 }
 0x3f0   :  { %v1138_v36 = vcombine.low (!%p1137_p3), %v1462_v21, %v1467_v22  ;;  %v1139_v39 = vcombine.low (!%p1137_p3), %v1472_v23, %v1477_v24  ;;  %v648_v40 = vld [vmem:[#allocation4 + $0x18] sm:$0xff] (!%p1137_p3)  ;;  %v649_v43 = vld [vmem:[#allocation4 + $0x48] sm:$0xff] (!%p1137_p3)  ;;  %v745_v53 = vlaneseq (!%p1137_p3)  ;;  %vm743_vm8 = vcmp.gt.s32.totalorder (!%p1137_p3), %v1457_v20, 3 }
 0x3f1   :  { %645 = sbr.rel (%p1137_p3) target bundleno = 1273 (0x4f9), region = 49  ;;  %v650_v46 = vld [vmem:[#allocation4 + $0x78] sm:$0xff] (!%p1137_p3)  ;;  %v651_v52 = vld [vmem:[#allocation4 + $0xa8] sm:$0xff] (!%p1137_p3)  ;;  %v1350_v60 = vmov (!%p1137_p3), 0  }
 0x3f2   :  { %1197 = vmatprep.mubr.msk.bf16.mxu0 (!%p1137_p3), %vm90_vm1, %v1138_v36  ;;  %v746_v55 = vshrl.u32 (!%p1137_p3), %v745_v53, 7  ;;  %v744_v61 = vsel (!%p1137_p3), %vm743_vm8, 1, %v1350_v60  ;;  %v647_v2 = vld [vmem:[#allocation3] sm:$0xff] (!%p1137_p3) }
 0x3f4   :  { %v747_v58 = vsub.s32 (!%p1137_p3), 0, %v746_v55 }
 0x3f5   :  { %v646_v35 = vld [vmem:[#allocation2] sm:$0xff] (!%p1137_p3) }
 0x3f6   :  { %v652_v37 = vpack.c.bf16 (!%p1137_p3), %v646_v35, %v646_v35  ;;  %v748_v4 = vrot.slane (!%p1137_p3), %v744_v61, %v747_v58 }
 0x3f8   :  { %1224 = vmatprep.subr.msk.bf16.mxu0 %vm97_vm0, %v652_v37  ;;  %v670_v38 = vsel %vm97_vm0, %v652_v37, 0  ;;  %vm749_vm9 = vcmp.eq.s32.totalorder %v748_v4, 1 }
 0x3f9   :  { %1196 = vmatpush3.bf16.msra.mxu0 %v670_v38 }
 0x3fc   :  { %1198 = vmatmul.mubr.msk.bf16.vlgmr.msra.gmra.mrb[0].mxu0 %vm90_vm1, %v1139_v39 }
 0x4cf   :  { %v1199_v41 = vpop.f32.mrb[0].mxu0 }
 0x4d0   :  { %v706_v42 = vpop.f32.mrb[1].mxu0  ;;  %v723_v50 = vadd.f32 %v1199_v41, %v650_v46 }
 0x4d1   :  { %v721_v44 = vadd.f32 %v706_v42, %v648_v40  ;;  %v1200_v45 = vpop.f32.mrb[2].mxu0 }
 0x4d2   :  { %v709_v47 = vpop.f32.mrb[3].mxu0  ;;  %v724_v54 = vadd.f32 %v1200_v45, %v651_v52 }
 0x4d3   :  { %v725_v48 = vmul.f32 0.5, %v721_v44  ;;  %v722_v49 = vadd.f32 %v709_v47, %v649_v43 }
 0x4d4   :  { %v734_v56 = vmul.f32 0.5, %v724_v54 }
 0x4d5   :  { %1279 = vtanh.f32 %v725_v48  ;;  %v729_v51 = vmul.f32 0.5, %v722_v49 }
 0x4d7   :  { %1281 = vtanh.f32 %v729_v51 }
 0x4d8   :  { %1283 = vtanh.f32 %v723_v50 }
 0x4d9   :  { %1285 = vtanh.f32 %v734_v56 }
 0x4df   :  { %v1280_v57 = vpop.eup %1279 }
 0x4e0   :  { %v727_v59 = vmul.f32 0.5, %v1280_v57 }
 0x4e1   :  { %v1282_v62 = vpop.eup %1281 }
 0x4e2   :  { %v728_v63 = vadd.f32 0.5, %v727_v59  ;;  %v731_v0 = vmul.f32 0.5, %v1282_v62  ;;  %v1284_v1 = vpop.eup %1283 }
 0x4e3   :  { %v1286_v10 = vpop.eup %1285 }
 0x4e4   :  { %v739_v5 = vmul.f32 %v1284_v1, %v728_v63  ;;  %v732_v6 = vadd.f32 0.5, %v731_v0  ;;  %v736_v11 = vmul.f32 0.5, %v1286_v10 }
 0x4e6   :  { %v738_v7 = vmul.f32 %v732_v6, %v647_v2  ;;  %v737_v12 = vadd.f32 0.5, %v736_v11 }
 0x4e8   :  { %v740_v8 = vadd.f32 %v739_v5, %v738_v7 }
 0x4ea   :  { %1287 = vtanh.f32 %v740_v8  ;;  %v752_v9 = vsel %vm749_vm9, %v740_v8, %v647_v2 }
 0x4eb   :  { %753 = vst [vmem:[#allocation3] sm:$0xff] %v752_v9 }
 0x4f4   :  { %v1288_v13 = vpop.eup %1287 }
 0x4f5   :  { %v742_v14 = vmul.f32 %v1288_v13, %v737_v12 }
 0x4f7   :  { %v750_v15 = vsel %vm749_vm9, %v742_v14, %v646_v35 }
 0x4f8   :  { %751 = vst [vmem:[#allocation2] sm:$0xff] %v750_v15 }
 0x4f9 PF:  { %p1142_p4 = scmp.le.s32.totalorder %s1599_s0, 4 }
 0x4fa   :  { %v1143_v17 = vcombine.low (!%p1142_p4), %v1462_v21, %v1467_v22  ;;  %v1144_v25 = vcombine.low (!%p1142_p4), %v1472_v23, %v1477_v24  ;;  %v760_v26 = vld [vmem:[#allocation4 + $0x20] sm:$0xff] (!%p1142_p4)  ;;  %v761_v29 = vld [vmem:[#allocation4 + $0x50] sm:$0xff] (!%p1142_p4)  ;;  %v857_v39 = vlaneseq (!%p1142_p4)  ;;  %vm855_vm10 = vcmp.gt.s32.totalorder (!%p1142_p4), %v1457_v20, 4  ;;  %v759_v52 = vld [vmem:[#allocation3] sm:$0xff] (!%p1142_p4) }
 0x4fb   :  { %757 = sbr.rel (%p1142_p4) target bundleno = 1539 (0x603), region = 53  ;;  %v762_v32 = vld [vmem:[#allocation4 + $0x80] sm:$0xff] (!%p1142_p4)  ;;  %v763_v38 = vld [vmem:[#allocation4 + $0xb0] sm:$0xff] (!%p1142_p4)  ;;  %v1351_v46 = vmov (!%p1142_p4), 0  }
 0x4fc   :  { %1203 = vmatprep.mubr.msk.bf16.mxu0 (!%p1142_p4), %vm90_vm1, %v1143_v17  ;;  %v858_v41 = vshrl.u32 (!%p1142_p4), %v857_v39, 7  ;;  %v856_v47 = vsel (!%p1142_p4), %vm855_vm10, 1, %v1351_v46 }
 0x4fe   :  { %v859_v44 = vsub.s32 (!%p1142_p4), 0, %v858_v41 }
 0x4ff   :  { %v758_v16 = vld [vmem:[#allocation2] sm:$0xff] (!%p1142_p4) }
 0x500   :  { %v764_v18 = vpack.c.bf16 (!%p1142_p4), %v758_v16, %v758_v16  ;;  %v860_v53 = vrot.slane (!%p1142_p4), %v856_v47, %v859_v44 }
 0x502   :  { %1225 = vmatprep.subr.msk.bf16.mxu0 %vm97_vm0, %v764_v18  ;;  %v782_v19 = vsel %vm97_vm0, %v764_v18, 0  ;;  %vm861_vm11 = vcmp.eq.s32.totalorder %v860_v53, 1 }
 0x503   :  { %1202 = vmatpush3.bf16.msra.mxu0 %v782_v19 }
 0x506   :  { %1204 = vmatmul.mubr.msk.bf16.vlgmr.msra.gmra.mrb[0].mxu0 %vm90_vm1, %v1144_v25 }
 0x5d9   :  { %v1205_v27 = vpop.f32.mrb[0].mxu0 }
 0x5da   :  { %v818_v28 = vpop.f32.mrb[1].mxu0  ;;  %v835_v36 = vadd.f32 %v1205_v27, %v762_v32 }
 0x5db   :  { %v833_v30 = vadd.f32 %v818_v28, %v760_v26  ;;  %v1206_v31 = vpop.f32.mrb[2].mxu0 }
 0x5dc   :  { %v821_v33 = vpop.f32.mrb[3].mxu0  ;;  %v836_v40 = vadd.f32 %v1206_v31, %v763_v38 }
 0x5dd   :  { %v837_v34 = vmul.f32 0.5, %v833_v30  ;;  %v834_v35 = vadd.f32 %v821_v33, %v761_v29 }
 0x5de   :  { %v846_v42 = vmul.f32 0.5, %v836_v40 }
 0x5df   :  { %1289 = vtanh.f32 %v837_v34  ;;  %v841_v37 = vmul.f32 0.5, %v834_v35 }
 0x5e1   :  { %1291 = vtanh.f32 %v841_v37 }
 0x5e2   :  { %1293 = vtanh.f32 %v835_v36 }
 0x5e3   :  { %1295 = vtanh.f32 %v846_v42 }
 0x5e9   :  { %v1290_v43 = vpop.eup %1289 }
 0x5ea   :  { %v839_v45 = vmul.f32 0.5, %v1290_v43 }
 0x5eb   :  { %v1292_v48 = vpop.eup %1291 }
 0x5ec   :  { %v840_v49 = vadd.f32 0.5, %v839_v45  ;;  %v843_v50 = vmul.f32 0.5, %v1292_v48  ;;  %v1294_v51 = vpop.eup %1293 }
 0x5ed   :  { %v1296_v59 = vpop.eup %1295 }
 0x5ee   :  { %v851_v54 = vmul.f32 %v1294_v51, %v840_v49  ;;  %v844_v55 = vadd.f32 0.5, %v843_v50  ;;  %v848_v60 = vmul.f32 0.5, %v1296_v59 }
 0x5f0   :  { %v850_v56 = vmul.f32 %v844_v55, %v759_v52  ;;  %v849_v61 = vadd.f32 0.5, %v848_v60 }
 0x5f2   :  { %v852_v57 = vadd.f32 %v851_v54, %v850_v56 }
 0x5f4   :  { %1297 = vtanh.f32 %v852_v57  ;;  %v864_v58 = vsel %vm861_vm11, %v852_v57, %v759_v52 }
 0x5f5   :  { %865 = vst [vmem:[#allocation3] sm:$0xff] %v864_v58 }
 0x5fe   :  { %v1298_v62 = vpop.eup %1297 }
 0x5ff   :  { %v854_v63 = vmul.f32 %v1298_v62, %v849_v61 }
 0x601   :  { %v862_v0 = vsel %vm861_vm11, %v854_v63, %v758_v16 }
 0x602   :  { %863 = vst [vmem:[#allocation2] sm:$0xff] %v862_v0 }
 0x603 PF:  { %p1147_p5 = scmp.le.s32.totalorder %s1599_s0, 5 }
 0x604   :  { %v1148_v2 = vcombine.low (!%p1147_p5), %v1462_v21, %v1467_v22  ;;  %v1149_v6 = vcombine.low (!%p1147_p5), %v1472_v23, %v1477_v24  ;;  %v872_v7 = vld [vmem:[#allocation4 + $0x28] sm:$0xff] (!%p1147_p5)  ;;  %v873_v10 = vld [vmem:[#allocation4 + $0x58] sm:$0xff] (!%p1147_p5)  ;;  %v969_v18 = vlaneseq (!%p1147_p5)  ;;  %vm967_vm12 = vcmp.gt.s32.totalorder (!%p1147_p5), %v1457_v20, 5 }
 0x605   :  { %869 = sbr.rel (%p1147_p5) target bundleno = 1805 (0x70d), region = 57  ;;  %v874_v21 = vld [vmem:[#allocation4 + $0x88] sm:$0xff] (!%p1147_p5)  ;;  %v875_v17 = vld [vmem:[#allocation4 + $0xb8] sm:$0xff] (!%p1147_p5)  ;;  %v1352_v28 = vmov (!%p1147_p5), 0  }
 0x606   :  { %1209 = vmatprep.mubr.msk.bf16.mxu0 (!%p1147_p5), %vm90_vm1, %v1148_v2  ;;  %v970_v24 = vshrl.u32 (!%p1147_p5), %v969_v18, 7  ;;  %v968_v29 = vsel (!%p1147_p5), %vm967_vm12, 1, %v1352_v28  ;;  %v871_v34 = vld [vmem:[#allocation3] sm:$0xff] (!%p1147_p5) }
 0x608   :  { %v971_v26 = vsub.s32 (!%p1147_p5), 0, %v970_v24 }
 0x609   :  { %v870_v1 = vld [vmem:[#allocation2] sm:$0xff] (!%p1147_p5) }
 0x60a   :  { %v876_v4 = vpack.c.bf16 (!%p1147_p5), %v870_v1, %v870_v1  ;;  %v972_v35 = vrot.slane (!%p1147_p5), %v968_v29, %v971_v26 }
 0x60c   :  { %1226 = vmatprep.subr.msk.bf16.mxu0 %vm97_vm0, %v876_v4  ;;  %v894_v5 = vsel %vm97_vm0, %v876_v4, 0  ;;  %vm973_vm13 = vcmp.eq.s32.totalorder %v972_v35, 1 }
 0x60d   :  { %1208 = vmatpush3.bf16.msra.mxu0 %v894_v5 }
 0x610   :  { %1210 = vmatmul.mubr.msk.bf16.vlgmr.msra.gmra.mrb[0].mxu0 %vm90_vm1, %v1149_v6 }
 0x6e3   :  { %v1211_v8 = vpop.f32.mrb[0].mxu0 }
 0x6e4   :  { %v930_v9 = vpop.f32.mrb[1].mxu0  ;;  %v947_v15 = vadd.f32 %v1211_v8, %v874_v21 }
 0x6e5   :  { %v945_v11 = vadd.f32 %v930_v9, %v872_v7  ;;  %v1212_v12 = vpop.f32.mrb[2].mxu0 }
 0x6e6   :  { %v933_v22 = vpop.f32.mrb[3].mxu0  ;;  %v948_v23 = vadd.f32 %v1212_v12, %v875_v17 }
 0x6e7   :  { %v949_v13 = vmul.f32 0.5, %v945_v11  ;;  %v946_v14 = vadd.f32 %v933_v22, %v873_v10 }
 0x6e8   :  { %v958_v19 = vmul.f32 0.5, %v948_v23 }
 0x6e9   :  { %1299 = vtanh.f32 %v949_v13  ;;  %v953_v16 = vmul.f32 0.5, %v946_v14 }
 0x6eb   :  { %1301 = vtanh.f32 %v953_v16 }
 0x6ec   :  { %1303 = vtanh.f32 %v947_v15 }
 0x6ed   :  { %1305 = vtanh.f32 %v958_v19 }
 0x6f3   :  { %v1300_v25 = vpop.eup %1299 }
 0x6f4   :  { %v951_v27 = vmul.f32 0.5, %v1300_v25 }
 0x6f5   :  { %v1302_v30 = vpop.eup %1301 }
 0x6f6   :  { %v952_v31 = vadd.f32 0.5, %v951_v27  ;;  %v955_v32 = vmul.f32 0.5, %v1302_v30  ;;  %v1304_v33 = vpop.eup %1303 }
 0x6f7   :  { %v1306_v41 = vpop.eup %1305 }
 0x6f8   :  { %v963_v36 = vmul.f32 %v1304_v33, %v952_v31  ;;  %v956_v37 = vadd.f32 0.5, %v955_v32  ;;  %v960_v42 = vmul.f32 0.5, %v1306_v41 }
 0x6fa   :  { %v962_v38 = vmul.f32 %v956_v37, %v871_v34  ;;  %v961_v43 = vadd.f32 0.5, %v960_v42 }
 0x6fc   :  { %v964_v39 = vadd.f32 %v963_v36, %v962_v38 }
 0x6fe   :  { %1307 = vtanh.f32 %v964_v39  ;;  %v976_v40 = vsel %vm973_vm13, %v964_v39, %v871_v34 }
 0x6ff   :  { %977 = vst [vmem:[#allocation3] sm:$0xff] %v976_v40 }
 0x708   :  { %v1308_v44 = vpop.eup %1307 }
 0x709   :  { %v966_v45 = vmul.f32 %v1308_v44, %v961_v43 }
 0x70b   :  { %v974_v46 = vsel %vm973_vm13, %v966_v45, %v870_v1 }
 0x70c   :  { %975 = vst [vmem:[#allocation2] sm:$0xff] %v974_v46 }
 0x70d PF:  { %v991_v47 = vld [vmem:[%s1601_s2] sm:$0xf]  ;;  %1309 = vset.pattern.permute.xlu0 %v1345_v3  ;;  %1310 = vset.pattern.permute.xlu1 %v1345_v3  ;;  %v1312_v50 = vld [vmem:[%s1606_s7 + $0x8] ss:$0 sps:$4 sm:$0xff]   ;;  %v994_v52 = vld [vmem:[%s1607_s8 + $0x10] sm:$0xff]  ;;  %vm978_vm14 = vcmp.gt.s32.totalorder %v1457_v20, 0  ;;  %v981_v54 = vlaneseq }
 0x70e   :  { %1227 = vmatprep.subr.msk.bf16.mxu0 %vm97_vm0, %v991_v47  ;;  %v1025_v48 = vsel %vm97_vm0, %v991_v47, 0  ;;  %v1311_v49 = vld [vmem:[%s1606_s7] sm:$0xff]   ;;  %1007 = vperm.xlu1 %1310, %v994_v52   ;;  %v993_v53 = vld [vmem:[%s1607_s8 + $0x8] sm:$0xff]  ;;  %v980_v56 = vsel %vm978_vm14, 1, %v1345_v3  ;;  %s1353_s7 = smov [#allocation7]  }
 0x70f   :  { %1214 = vmatpush3.bf16.msra.mxu0 %v1025_v48  ;;  %v992_v51 = vld [vmem:[%s1607_s8] sm:$0xff]  ;;  %1215 = vmatprep.mubr.msk.bf16.mxu0 %vm90_vm1, %v1311_v49  ;;  %v982_v55 = vshrl.u32 %v981_v54, 7  ;;  %s1094_s8 = sshll.u32 %s1353_s7, 4  ;;  %s1095_s8 = int_to_ptr.vmem [resolvable:$true] %s1094_s8 }
 0x710   :  { %997 = vperm.xlu0 %1309, %v992_v51   ;;  %s1321_s30 = scalar_lea.vmem %s1095_s8, 256  ;;  %p1326_p7 = scmp.lt.s32.totalorder %s1095_s8, %s1095_s8 }
 0x711   :  { %v983_v57 = vsub.s32 0, %v982_v55  ;;  %p1322_p6 = scmp.ne.s32.totalorder %s1095_s8, %s1321_s30  ;;  %p1327_p8 = scmp.lt.s32.totalorder %s1321_s30, %s1321_s30 }
 0x712   :  { %1216 = vmatmul.mubr.msk.bf16.vlgmr.msra.gmra.mrb[0].mxu0 %vm90_vm1, %v1312_v50 }
 0x713   :  { %v979_v58 = vld [vmem:[#allocation2] sm:$0xff]  ;;  %v984_v59 = vrot.slane %v980_v56, %v983_v57  ;;  %p1328_p9 = por %p1327_p8, %p1326_p7 }
 0x714   :  { %1002 = vperm.xlu0 %1309, %v993_v53  }
 0x715   :  { %vm985_vm15 = vcmp.eq.s32.totalorder %v984_v59, 1  ;;  %p1329_p10 = pnand %p1328_p9, %p1322_p6 }
 0x716   :  { %v986_v60 = vsel %vm985_vm15, %v979_v58, 0.0 }
 0x717   :  { %987 = vst [vmem:[#allocation7] sm:$0xff] %v986_v60 }
 0x78d   :  { %v1008_v4 = vpop.permute.xlu1 %1007 }
 0x78f   :  { %v998_v61 = vpop.permute.xlu0 %997 }
 0x793   :  { %v1003_v20 = vpop.permute.xlu0 %1002 }
 0x7e5   :  { %v1217_v62 = vpop.f32.mrb[0].mxu0 }
 0x7e6   :  { %v1061_v63 = vpop.f32.mrb[1].mxu0  ;;  %v1070_v7 = vadd.f32 %v1217_v62, %v1008_v4 }
 0x7e7   :  { %v1062_v0 = vadd.f32 %v1061_v63, %v998_v61  ;;  %v1218_v1 = vpop.f32.mrb[2].mxu0 }
 0x7e8   :  { %v1064_v2 = vpop.f32.mrb[3].mxu0  ;;  %v1080_v3 = vmul.f32 0.5, %v1070_v7 }
 0x7e9   :  { %v1075_v5 = vmul.f32 0.5, %v1062_v0  ;;  %v1065_v6 = vadd.f32 %v1064_v2, %v1003_v20 }
 0x7eb   :  { %1313 = vtanh.f32 %v1075_v5 }
 0x7ec   :  { %1315 = vtanh.f32 %v1065_v6 }
 0x7ed   :  { %1317 = vtanh.f32 %v1080_v3 }
 0x7f5   :  { %v1314_v8 = vpop.eup %1313 }
 0x7f6   :  { %v1077_v9 = vmul.f32 0.5, %v1314_v8  ;;  %v1316_v11 = vpop.eup %1315 }
 0x7f7   :  { %v1318_v21 = vpop.eup %1317 }
 0x7f8   :  { %v1078_v10 = vadd.f32 0.5, %v1077_v9  ;;  %v1082_v22 = vmul.f32 0.5, %v1318_v21 }
 0x7fa   :  { %v1084_v12 = vmul.f32 %v1316_v11, %v1078_v10  ;;  %v1083_v13 = vadd.f32 0.5, %v1082_v22 }
 0x7fc   :  { %1319 = vtanh.f32 %v1084_v12 }
 0x806   :  { %v1320_v14 = vpop.eup %1319 }
 0x807   :  { %v1086_v15 = vmul.f32 %v1320_v14, %v1083_v13 }
 0x809   :  { %v1087_v16 = vsel %vm985_vm15, %v1086_v15, 0.0 }
 0x80a   :  { %1088 = vst [vmem:[#allocation7 + $0x8] sm:$0xff] %v1087_v16 }
 0x80b   :  { %1332 = shalt.err (!%p1329_p10)
}
 0x80c   :  { %s1333_s12 = scalar_lea.hbm %s1608_s9, 256 }
 0x80d   :  { %p1334_p11 = scmp.ne.s32.totalorder %s1608_s9, %s1333_s12  ;;  %p1337_p12 = scmp.lt.u32.totalorder %s1333_s12, %s1608_s9 }
 0x80f   :  { %p1339_p13 = pnand %p1337_p12, %p1334_p11 }
 0x811   :  { %1342 = shalt.err (!%p1339_p13)
}
 0x812   :  { %s1354_s15 = smov 128   ;;  %s1355_s16 = smov 8  }
 0x813   :  { %1100 = dma.vmem_to_hbm [thread:$0]  %s1095_s8, 256, %s1608_s9, [#allocation8], %s1354_s15, %s1354_s15, %s1355_s16  }
 0x814   :  { %1343 = dma.done.wait [#allocation8], 256  }
 0x815   :  { %1344 = vsyncadd [#allocation8], 4294967040 }
 0x816   :  { %1104 = vsyncpa [#allocation8], 1 }

</bundles_post_ra>
